<compile_context>
chip_gen: v7x
topology: tpu7x:2x2x1
jax: 0.10.0
libtpu: 0.0.40
codegen_flags: <defaults>
</compile_context>

<pallas_src>
import numpy as np

import jax
import jax.numpy as jnp
from jax.experimental import pallas as pl
from jax.experimental.pallas import tpu as pltpu


def _make_kernel(n_l1_steps, n_steps):
    """n_l1_steps = #active layer-1 branches, n_steps = total grid steps."""

    def kernel(w1_idx_ref, w2_idx_ref,       # SMEM scalar prefetch (used by index_maps)
               x_ref,                         # (B, 784)       bf16
               w1_ref,                        # (1, 784, 400)  bf16 (current active branch)
               w2_ref,                        # (1, 400, 128)  bf16 (current active branch)
               b1s_ref,                       # (1, 400)       f32  (sum of active biases)
               b2s_ref,                       # (1, 128)       f32  (sum of active biases)
               wf_ref,                        # (128, 10)      bf16
               bfc_ref,                       # (1, 10)        f32
               out_ref,                       # (B, 10)        f32
               acc1_ref,                      # VMEM (B, 400)  f32
               acc2_ref):                     # VMEM (B, 128)  f32
        del w1_idx_ref, w2_idx_ref            # only consumed by the index_maps
        i = pl.program_id(0)

        @pl.when(i == 0)
        def _init():
            # Accumulators start at the pre-summed biases (hoisted broadcast).
            acc1_ref[...] = jnp.broadcast_to(b1s_ref[...], acc1_ref.shape)
            acc2_ref[...] = jnp.broadcast_to(b2s_ref[...], acc2_ref.shape)

        @pl.when(i < n_l1_steps)
        def _layer1():
            acc1_ref[...] += jnp.dot(x_ref[...], w1_ref[0],
                                     preferred_element_type=jnp.float32)

        @pl.when(i >= n_l1_steps)
        def _layer2():
            h1 = jnp.maximum(acc1_ref[...], 0.0).astype(jnp.bfloat16)
            acc2_ref[...] += jnp.dot(h1, w2_ref[0],
                                     preferred_element_type=jnp.float32)

        @pl.when(i == n_steps - 1)
        def _final():
            h2 = jnp.maximum(acc2_ref[...], 0.0).astype(jnp.bfloat16)
            out_ref[...] = (jnp.dot(h2, wf_ref[...],
                                    preferred_element_type=jnp.float32)
                            + bfc_ref[...])

    return kernel


def rps_net_mlp_forward(x, params, path, last=0):
    """Pallas implementation of RPS_net_mlp.forward(x, path, last)."""
    w1, b1, w2, b2, wf, bfin = params
    assert last == 0, "only one final layer exists in the module's __init__"
    M, D_in, H1 = w1.shape
    H2 = w2.shape[2]
    n_cls = wf.shape[1]
    B = x.shape[0]

    # `path` is host-side data in the original module (Python list); branch
    # selection is resolved here, exactly like the PyTorch `if path[l][j]==1`.
    path_np = np.asarray(path)
    act1 = [0] + [j for j in range(1, M) if int(path_np[0][j]) == 1]
    act2 = [0] + [j for j in range(1, M) if int(path_np[1][j]) == 1]
    g1, g2 = len(act1), len(act2)
    g = g1 + g2

    # Per-grid-step branch indices.  Outside a layer's phase the index repeats
    # (last active for w1, first active for w2) so Pallas never re-fetches the
    # block; w2's first block is effectively prefetched during layer-1 steps.
    w1_steps = np.array([act1[min(i, g1 - 1)] for i in range(g)], np.int32)
    w2_steps = np.array([act2[max(i - g1, 0)] for i in range(g)], np.int32)

    # bf16 weight/activation storage; f32 biases & accumulation.
    xb = x.astype(jnp.bfloat16)
    w1b = w1.astype(jnp.bfloat16)
    w2b = w2.astype(jnp.bfloat16)
    wfb = wf.astype(jnp.bfloat16)

    # Pre-sum the biases of the active branches (tiny arrays).
    b1_sum = jnp.sum(b1[np.array(act1)], axis=0, keepdims=True).astype(jnp.float32)  # (1, H1)
    b2_sum = jnp.sum(b2[np.array(act2)], axis=0, keepdims=True).astype(jnp.float32)  # (1, H2)
    bf_row = jnp.asarray(bfin, jnp.float32).reshape(1, n_cls)                         # (1, 10)

    grid_spec = pltpu.PrefetchScalarGridSpec(
        num_scalar_prefetch=2,
        grid=(g,),
        in_specs=[
            pl.BlockSpec((B, D_in),     lambda i, a1, a2: (0, 0)),        # x (fetched once)
            pl.BlockSpec((1, D_in, H1), lambda i, a1, a2: (a1[i], 0, 0)), # active w1 branch
            pl.BlockSpec((1, H1, H2),   lambda i, a1, a2: (a2[i], 0, 0)), # active w2 branch
            pl.BlockSpec((1, H1),       lambda i, a1, a2: (0, 0)),        # b1 (summed)
            pl.BlockSpec((1, H2),       lambda i, a1, a2: (0, 0)),        # b2 (summed)
            pl.BlockSpec((H2, n_cls),   lambda i, a1, a2: (0, 0)),        # wf
            pl.BlockSpec((1, n_cls),    lambda i, a1, a2: (0, 0)),        # bf
        ],
        out_specs=pl.BlockSpec((B, n_cls), lambda i, a1, a2: (0, 0)),
        scratch_shapes=[pltpu.VMEM((B, H1), jnp.float32),
                        pltpu.VMEM((B, H2), jnp.float32)],
    )

    # TODO(synk): on v7x a second "parallel" grid axis (N-split of H1) would
    # let both TensorCores share the weight traffic; omitted at these sizes.
    return pl.pallas_call(
        _make_kernel(g1, g),
        out_shape=jax.ShapeDtypeStruct((B, n_cls), jnp.float32),
        grid_spec=grid_spec,
        compiler_params=pltpu.CompilerParams(
            dimension_semantics=("arbitrary",),
            vmem_limit_bytes=32 * 1024 * 1024,
        ),
    )(jnp.asarray(w1_steps), jnp.asarray(w2_steps),
      xb, w1b, w2b, b1_sum, b2_sum, wfb, bf_row)


def init_params(key, M):
    """Deterministic init mimicking nn.Linear's U(-1/sqrt(fan_in), 1/sqrt(fan_in))."""
    ks = jax.random.split(key, 6)

    def u(k, shape, fan_in):
        bound = 1.0 / jnp.sqrt(fan_in)
        return jax.random.uniform(k, shape, jnp.float32, -bound, bound)

    w1 = u(ks[0], (M, 784, 400), 784.0)
    b1 = u(ks[1], (M, 400), 784.0)
    w2 = u(ks[2], (M, 400, 128), 400.0)
    b2 = u(ks[3], (M, 128), 400.0)
    wf = u(ks[4], (128, 10), 128.0)
    bf = u(ks[5], (1, 10), 128.0)
    return w1, b1, w2, b2, wf, bf


def reference_forward(x, params, path):
    """Pure-JAX reference matching the PyTorch forward semantics (with the
    same bf16 weight/activation storage the kernel uses; f32 accumulation)."""
    w1, b1, w2, b2, wf, bfin = params
    M = w1.shape[0]
    xq = x.astype(jnp.bfloat16).astype(jnp.float32)
    w1q = w1.astype(jnp.bfloat16).astype(jnp.float32)
    w2q = w2.astype(jnp.bfloat16).astype(jnp.float32)
    wfq = wf.astype(jnp.bfloat16).astype(jnp.float32)

    y = xq @ w1q[0] + b1[0]
    for j in range(1, M):
        if int(path[0][j]) == 1:
            y = y + xq @ w1q[j] + b1[j]
    h = jnp.maximum(y, 0.0).astype(jnp.bfloat16).astype(jnp.float32)

    y = h @ w2q[0] + b2[0]
    for j in range(1, M):
        if int(path[1][j]) == 1:
            y = y + h @ w2q[j] + b2[j]
    h = jnp.maximum(y, 0.0).astype(jnp.bfloat16).astype(jnp.float32)

    return h @ wfq + bfin[0]


if __name__ == "__main__":
    M = 3          # number of parallel modules per layer (args.M)
    B = 8          # batch size
    key = jax.random.PRNGKey(0)
    k_params, k_x = jax.random.split(key)

    params = init_params(k_params, M)
    x = jax.random.normal(k_x, (B, 784), jnp.float32)
    # path matrix: (2, M) of {0,1}; column 0 is always treated as active.
    path = [[1, 0, 1],
            [1, 1, 0]]

    out = rps_net_mlp_forward(x, params, path, last=0)
    out = jax.block_until_ready(out)

    ref = reference_forward(x, params, path)
    assert out.shape == (B, 10)
    err = float(jnp.max(jnp.abs(out - ref)))
    assert jnp.allclose(out, ref, atol=5e-3, rtol=5e-3), f"mismatch vs reference (max err {err})"
    print("KERNEL_OK")
</pallas_src>

<mosaic_0001>
module attributes {stable_mosaic.version = 11 : i64} {
  func.func @kernel(%arg0: i32, %arg1: memref<4xi32, #tpu.memory_space<smem>>, %arg2: memref<4xi32, #tpu.memory_space<smem>>, %arg3: memref<8x784xbf16, #tpu.memory_space<vmem>>, %arg4: memref<1x784x400xbf16, #tpu.memory_space<vmem>>, %arg5: memref<1x400x128xbf16, #tpu.memory_space<vmem>>, %arg6: memref<1x400xf32, #tpu.memory_space<vmem>>, %arg7: memref<1x128xf32, #tpu.memory_space<vmem>>, %arg8: memref<128x10xbf16, #tpu.memory_space<vmem>>, %arg9: memref<1x10xf32, #tpu.memory_space<vmem>>, %arg10: memref<8x10xf32, #tpu.memory_space<vmem>>, %arg11: memref<8x400xf32, #tpu.memory_space<vmem>>, %arg12: memref<8x128xf32, #tpu.memory_space<vmem>>) attributes {dimension_semantics = [#tpu.dimension_semantics<arbitrary>], iteration_bounds = array<i64: 4>, scalar_prefetch = 2 : i64, scratch_operands = 2 : i64, tpu.core_type = #tpu.core_type<tc>, window_params = [{pipeline_mode = #tpu.pipeline_mode<synchronous>, transform_indices = @transform_0, window_bounds = array<i64: 8, 784>}, {transform_indices = @transform_1, window_bounds = array<i64: 1, 784, 400>}, {transform_indices = @transform_2, window_bounds = array<i64: 1, 400, 128>}, {pipeline_mode = #tpu.pipeline_mode<synchronous>, transform_indices = @transform_3, window_bounds = array<i64: 1, 400>}, {pipeline_mode = #tpu.pipeline_mode<synchronous>, transform_indices = @transform_4, window_bounds = array<i64: 1, 128>}, {pipeline_mode = #tpu.pipeline_mode<synchronous>, transform_indices = @transform_5, window_bounds = array<i64: 128, 10>}, {pipeline_mode = #tpu.pipeline_mode<synchronous>, transform_indices = @transform_6, window_bounds = array<i64: 1, 10>}, {pipeline_mode = #tpu.pipeline_mode<synchronous>, transform_indices = @transform_7, window_bounds = array<i64: 8, 10>}]} {
    %c0_i32 = arith.constant 0 : i32
    %0 = arith.cmpi eq, %arg0, %c0_i32 : i32
    %1 = arith.extui %0 : i1 to i32
    %c0_i32_0 = arith.constant 0 : i32
    %2 = arith.cmpi ne, %1, %c0_i32_0 : i32
    scf.if %2 {
      %c0 = arith.constant 0 : index
      %c0_5 = arith.constant 0 : index
      %12 = vector.load %arg6[%c0, %c0_5] : memref<1x400xf32, #tpu.memory_space<vmem>>, vector<1x400xf32>
      %13 = vector.shape_cast %12 : vector<1x400xf32> to vector<1x400xf32>
      %14 = vector.broadcast %13 : vector<1x400xf32> to vector<8x400xf32>
      %c0_6 = arith.constant 0 : index
      %c0_7 = arith.constant 0 : index
      %15 = vector.load %arg11[%c0_6, %c0_7] : memref<8x400xf32, #tpu.memory_space<vmem>>, vector<8x400xf32>
      tpu.vector_store %arg11[%c0_6, %c0_7], %14 {strides = array<i32>} : memref<8x400xf32, #tpu.memory_space<vmem>>, vector<8x400xf32>,
      %c0_8 = arith.constant 0 : index
      %c0_9 = arith.constant 0 : index
      %16 = vector.load %arg7[%c0_8, %c0_9] : memref<1x128xf32, #tpu.memory_space<vmem>>, vector<1x128xf32>
      %17 = vector.shape_cast %16 : vector<1x128xf32> to vector<1x128xf32>
      %18 = vector.broadcast %17 : vector<1x128xf32> to vector<8x128xf32>
      %c0_10 = arith.constant 0 : index
      %c0_11 = arith.constant 0 : index
      %19 = vector.load %arg12[%c0_10, %c0_11] : memref<8x128xf32, #tpu.memory_space<vmem>>, vector<8x128xf32>
      tpu.vector_store %arg12[%c0_10, %c0_11], %18 {strides = array<i32>} : memref<8x128xf32, #tpu.memory_space<vmem>>, vector<8x128xf32>,
    } else {
    }
    %c2_i32 = arith.constant 2 : i32
    %3 = arith.cmpi slt, %arg0, %c2_i32 : i32
    %4 = arith.extui %3 : i1 to i32
    %c0_i32_1 = arith.constant 0 : i32
    %5 = arith.cmpi ne, %4, %c0_i32_1 : i32
    scf.if %5 {
      %c0 = arith.constant 0 : index
      %c0_5 = arith.constant 0 : index
      %12 = vector.load %arg11[%c0, %c0_5] : memref<8x400xf32, #tpu.memory_space<vmem>>, vector<8x400xf32>
      %c0_6 = arith.constant 0 : index
      %c0_7 = arith.constant 0 : index
      %13 = vector.load %arg3[%c0_6, %c0_7] : memref<8x784xbf16, #tpu.memory_space<vmem>>, vector<8x784xbf16>
      %c0_8 = arith.constant 0 : index
      %c0_9 = arith.constant 0 : index
      %c0_10 = arith.constant 0 : index
      %14 = vector.load %arg4[%c0_8, %c0_9, %c0_10] : memref<1x784x400xbf16, #tpu.memory_space<vmem>>, vector<1x784x400xbf16>
      %15 = vector.shape_cast %14 : vector<1x784x400xbf16> to vector<784x400xbf16>
      %cst = arith.constant dense<0.000000e+00> : vector<8x400xf32>
      %16 = tpu.matmul %13, %15, %cst {dimension_numbers = #tpu.dot_dimension_numbers<[1], [0], [0], [1], [0, 0, 1, 1], [], []>} : vector<8x784xbf16>, vector<784x400xbf16>, vector<8x400xf32> -> vector<8x400xf32>
      %17 = arith.addf %12, %16 : vector<8x400xf32>
      %c0_11 = arith.constant 0 : index
      %c0_12 = arith.constant 0 : index
      %18 = vector.load %arg11[%c0_11, %c0_12] : memref<8x400xf32, #tpu.memory_space<vmem>>, vector<8x400xf32>
      tpu.vector_store %arg11[%c0_11, %c0_12], %17 {strides = array<i32>} : memref<8x400xf32, #tpu.memory_space<vmem>>, vector<8x400xf32>,
    } else {
    }
    %c2_i32_2 = arith.constant 2 : i32
    %6 = arith.cmpi sge, %arg0, %c2_i32_2 : i32
    %7 = arith.extui %6 : i1 to i32
    %c0_i32_3 = arith.constant 0 : i32
    %8 = arith.cmpi ne, %7, %c0_i32_3 : i32
    scf.if %8 {
      %c0 = arith.constant 0 : index
      %c0_5 = arith.constant 0 : index
      %12 = vector.load %arg11[%c0, %c0_5] : memref<8x400xf32, #tpu.memory_space<vmem>>, vector<8x400xf32>
      %cst = arith.constant 0.000000e+00 : f32
      %13 = vector.broadcast %cst : f32 to vector<8x400xf32>
      %14 = arith.maximumf %12, %13 : vector<8x400xf32>
      %15 = arith.truncf %14 : vector<8x400xf32> to vector<8x400xbf16>
      %c0_6 = arith.constant 0 : index
      %c0_7 = arith.constant 0 : index
      %16 = vector.load %arg12[%c0_6, %c0_7] : memref<8x128xf32, #tpu.memory_space<vmem>>, vector<8x128xf32>
      %c0_8 = arith.constant 0 : index
      %c0_9 = arith.constant 0 : index
      %c0_10 = arith.constant 0 : index
      %17 = vector.load %arg5[%c0_8, %c0_9, %c0_10] : memref<1x400x128xbf16, #tpu.memory_space<vmem>>, vector<1x400x128xbf16>
      %18 = vector.shape_cast %17 : vector<1x400x128xbf16> to vector<400x128xbf16>
      %cst_11 = arith.constant dense<0.000000e+00> : vector<8x128xf32>
      %19 = tpu.matmul %15, %18, %cst_11 {dimension_numbers = #tpu.dot_dimension_numbers<[1], [0], [0], [1], [0, 0, 1, 1], [], []>} : vector<8x400xbf16>, vector<400x128xbf16>, vector<8x128xf32> -> vector<8x128xf32>
      %20 = arith.addf %16, %19 : vector<8x128xf32>
      %c0_12 = arith.constant 0 : index
      %c0_13 = arith.constant 0 : index
      %21 = vector.load %arg12[%c0_12, %c0_13] : memref<8x128xf32, #tpu.memory_space<vmem>>, vector<8x128xf32>
      tpu.vector_store %arg12[%c0_12, %c0_13], %20 {strides = array<i32>} : memref<8x128xf32, #tpu.memory_space<vmem>>, vector<8x128xf32>,
    } else {
    }
    %c3_i32 = arith.constant 3 : i32
    %9 = arith.cmpi eq, %arg0, %c3_i32 : i32
    %10 = arith.extui %9 : i1 to i32
    %c0_i32_4 = arith.constant 0 : i32
    %11 = arith.cmpi ne, %10, %c0_i32_4 : i32
    scf.if %11 {
      %c0 = arith.constant 0 : index
      %c0_5 = arith.constant 0 : index
      %12 = vector.load %arg12[%c0, %c0_5] : memref<8x128xf32, #tpu.memory_space<vmem>>, vector<8x128xf32>
      %cst = arith.constant 0.000000e+00 : f32
      %13 = vector.broadcast %cst : f32 to vector<8x128xf32>
      %14 = arith.maximumf %12, %13 : vector<8x128xf32>
      %15 = arith.truncf %14 : vector<8x128xf32> to vector<8x128xbf16>
      %c0_6 = arith.constant 0 : index
      %c0_7 = arith.constant 0 : index
      %16 = vector.load %arg8[%c0_6, %c0_7] : memref<128x10xbf16, #tpu.memory_space<vmem>>, vector<128x10xbf16>
      %cst_8 = arith.constant dense<0.000000e+00> : vector<8x10xf32>
      %17 = tpu.matmul %15, %16, %cst_8 {dimension_numbers = #tpu.dot_dimension_numbers<[1], [0], [0], [1], [0, 0, 1, 1], [], []>} : vector<8x128xbf16>, vector<128x10xbf16>, vector<8x10xf32> -> vector<8x10xf32>
      %c0_9 = arith.constant 0 : index
      %c0_10 = arith.constant 0 : index
      %18 = vector.load %arg9[%c0_9, %c0_10] : memref<1x10xf32, #tpu.memory_space<vmem>>, vector<1x10xf32>
      %19 = vector.broadcast %18 : vector<1x10xf32> to vector<8x10xf32>
      %20 = arith.addf %17, %19 : vector<8x10xf32>
      %c0_11 = arith.constant 0 : index
      %c0_12 = arith.constant 0 : index
      %21 = vector.load %arg10[%c0_11, %c0_12] : memref<8x10xf32, #tpu.memory_space<vmem>>, vector<8x10xf32>
      tpu.vector_store %arg10[%c0_11, %c0_12], %20 {strides = array<i32>} : memref<8x10xf32, #tpu.memory_space<vmem>>, vector<8x10xf32>,
    } else {
    }
    return
  }
  func.func @transform_0(%arg0: i32, %arg1: memref<4xi32, #tpu.memory_space<smem>>, %arg2: memref<4xi32, #tpu.memory_space<smem>>) -> (i32, i32) {
    %c0_i32 = arith.constant 0 : i32
    %c0_i32_0 = arith.constant 0 : i32
    %c0_i32_1 = arith.constant 0 : i32
    return %c0_i32, %c0_i32_0 : i32, i32
  }
  func.func @transform_1(%arg0: i32, %arg1: memref<4xi32, #tpu.memory_space<smem>>, %arg2: memref<4xi32, #tpu.memory_space<smem>>) -> (i32, i32, i32) {
    %0 = arith.index_cast %arg0 : i32 to index
    %1 = memref.load %arg1[%0] : memref<4xi32, #tpu.memory_space<smem>>
    %c0_i32 = arith.constant 0 : i32
    %c0_i32_0 = arith.constant 0 : i32
    %c0_i32_1 = arith.constant 0 : i32
    return %1, %c0_i32, %c0_i32_0 : i32, i32, i32
  }
  func.func @transform_2(%arg0: i32, %arg1: memref<4xi32, #tpu.memory_space<smem>>, %arg2: memref<4xi32, #tpu.memory_space<smem>>) -> (i32, i32, i32) {
    %0 = arith.index_cast %arg0 : i32 to index
    %1 = memref.load %arg2[%0] : memref<4xi32, #tpu.memory_space<smem>>
    %c0_i32 = arith.constant 0 : i32
    %c0_i32_0 = arith.constant 0 : i32
    %c0_i32_1 = arith.constant 0 : i32
    return %1, %c0_i32, %c0_i32_0 : i32, i32, i32
  }
  func.func @transform_3(%arg0: i32, %arg1: memref<4xi32, #tpu.memory_space<smem>>, %arg2: memref<4xi32, #tpu.memory_space<smem>>) -> (i32, i32) {
    %c0_i32 = arith.constant 0 : i32
    %c0_i32_0 = arith.constant 0 : i32
    %c0_i32_1 = arith.constant 0 : i32
    return %c0_i32, %c0_i32_0 : i32, i32
  }
  func.func @transform_4(%arg0: i32, %arg1: memref<4xi32, #tpu.memory_space<smem>>, %arg2: memref<4xi32, #tpu.memory_space<smem>>) -> (i32, i32) {
    %c0_i32 = arith.constant 0 : i32
    %c0_i32_0 = arith.constant 0 : i32
    %c0_i32_1 = arith.constant 0 : i32
    return %c0_i32, %c0_i32_0 : i32, i32
  }
  func.func @transform_5(%arg0: i32, %arg1: memref<4xi32, #tpu.memory_space<smem>>, %arg2: memref<4xi32, #tpu.memory_space<smem>>) -> (i32, i32) {
    %c0_i32 = arith.constant 0 : i32
    %c0_i32_0 = arith.constant 0 : i32
    %c0_i32_1 = arith.constant 0 : i32
    return %c0_i32, %c0_i32_0 : i32, i32
  }
  func.func @transform_6(%arg0: i32, %arg1: memref<4xi32, #tpu.memory_space<smem>>, %arg2: memref<4xi32, #tpu.memory_space<smem>>) -> (i32, i32) {
    %c0_i32 = arith.constant 0 : i32
    %c0_i32_0 = arith.constant 0 : i32
    %c0_i32_1 = arith.constant 0 : i32
    return %c0_i32, %c0_i32_0 : i32, i32
  }
  func.func @transform_7(%arg0: i32, %arg1: memref<4xi32, #tpu.memory_space<smem>>, %arg2: memref<4xi32, #tpu.memory_space<smem>>) -> (i32, i32) {
    %c0_i32 = arith.constant 0 : i32
    %c0_i32_0 = arith.constant 0 : i32
    %c0_i32_1 = arith.constant 0 : i32
    return %c0_i32, %c0_i32_0 : i32, i32
  }
}

</mosaic_0001>

<bundles_post_ra>
// kernel: tpu_custom_call.1
= control target key start
LH: loop header
LB: loop body
LE: loop exit
PB: predicated region body
PF: predicated region fallthrough
CT: control target
= control target key end

     0   :  { %s3540_s0 = inlined_call_operand.vmem [shape: s32[4], index: 0, kind: input, shape index: {}]   ;;  %s3541_s2 = inlined_call_operand.vmem [shape: bf16[8,784], index: 2, kind: input, shape index: {}]   ;;  %s3542_s3 = inlined_call_operand.vmem [shape: bf16[3,784,400], index: 3, kind: input, shape index: {}]   ;;  %s3543_s4 = inlined_call_operand.vmem [shape: bf16[3,400,128], index: 4, kind: input, shape index: {}]   ;;  %s3544_s5 = inlined_call_operand.vmem [shape: f32[1,400], index: 5, kind: input, shape index: {}]   ;;  %s3545_s6 = inlined_call_operand.vmem [shape: f32[1,128], index: 6, kind: input, shape index: {}]   ;;  %s3546_s7 = inlined_call_operand.vmem [shape: bf16[128,10], index: 7, kind: input, shape index: {}]   ;;  %s3547_s8 = inlined_call_operand.vmem [shape: f32[1,10], index: 8, kind: input, shape index: {}]   ;;  %s3548_s9 = inlined_call_operand.hbm [shape: f32[8,10], index: 9, kind: output, shape index: {}]   ;;  %s3549_s1 = inlined_call_operand.vmem [shape: s32[4], index: 1, kind: input, shape index: {}]  }
   0x1   :  { %s14_s11 = sshll.u32 %s3540_s0, 4  ;;  %s18_s14 = sshll.u32 %s3549_s1, 4  ;;  %s15_s11 = int_to_ptr.vmem [resolvable:$true] %s14_s11  ;;  %s19_s14 = int_to_ptr.vmem [resolvable:$true] %s18_s14 }
   0x2   :  { %s3047_s15 = scalar_lea.vmem %s15_s11, 16  ;;  %p3052_p1 = scmp.lt.s32.totalorder %s15_s11, %s15_s11 }
   0x3   :  { %p3048_p0 = scmp.ne.s32.totalorder %s15_s11, %s3047_s15  ;;  %p3053_p2 = scmp.lt.s32.totalorder %s3047_s15, %s3047_s15 }
   0x5   :  { %p3054_p3 = por %p3053_p2, %p3052_p1 }
   0x7   :  { %p3055_p4 = pnand %p3054_p3, %p3048_p0 }
   0x9   :  { %3058 = shalt.err (!%p3055_p4)  }
   0xa   :  { %s3111_s16 = smov [#allocation5]   ;;  %s3059_s17 = scalar_lea.vmem %s19_s14, 16 }
   0xb   :  { %17 = dma.vmem_to_smem %s15_s11, 16, %s3111_s16, [#allocation4] }
   0xc   :  { %p3060_p5 = scmp.ne.s32.totalorder %s19_s14, %s3059_s17  ;;  %p3064_p6 = scmp.lt.s32.totalorder %s19_s14, %s19_s14 }
   0xd   :  { %p3065_p7 = scmp.lt.s32.totalorder %s3059_s17, %s3059_s17 }
   0xf   :  { %p3066_p8 = por %p3065_p7, %p3064_p6 }
  0x11   :  { %p3067_p9 = pnand %p3066_p8, %p3060_p5 }
  0x13   :  { %3070 = shalt.err (!%p3067_p9)  }
  0x14   :  { %s3112_s0 = smov [#allocation6]  }
  0x15   :  { %21 = dma.vmem_to_smem %s19_s14, 16, %s3112_s0, [#allocation4] }
  0x16   :  { %3101 = dma.done.wait [#allocation4], 32 }
  0x17   :  { %3102 = vsyncadd [#allocation4], 4294967264 }
  0x18   :  { %23 = sfence }
  0x19   :  { %24 = vsyncpa [#allocation8], 0  ;;  %s3174_s1 = smov 0  }
  0x1a LB: > { %s3180_s18 = sadd.s32 4294967295, %s3109_s1   ;;  %p2387_p10 = scmp.ge.s32.totalorder %s3109_s1, 1  ;;  %s3109_s1 = sphi %s3174_s1, %s30_s1  }
  0x1b   : > { %p263_p11 = scmp.lt.s32.totalorder %s3109_s1, 5 }
  0x1d   : > { %p264_p12 = pnand %p2387_p10, %p263_p11 }
  0x1e   : > { %s297_s19 = sld [smem:[#allocation5 + %s3180_s18]] (!%p264_p12)  ;;  %p2390_p1 = scmp.ne.s32.totalorder (!%p264_p12), %s3180_s18, 0 }
  0x1f   : > { %267 = sbr.rel (%p264_p12) target bundleno = 1001 (0x3e9), region = 48  ;;  %s304_s20 = sld [smem:[#allocation6 + %s3180_s18]] (!%p264_p12) }
  0x24   : > { %p298_p13 = scmp.lt.s32.totalorder (!%p264_p12), %s297_s19, 2 }
  0x25   : > { %p305_p0 = scmp.lt.s32.totalorder (!%p264_p12), %s304_s20, 2 }
  0x26   : > { %s3551_s19 = smov (!%p298_p13, %s297_s19), 2  ;;  %315 = sbr.rel (%p2390_p1) target bundleno = 49 (0x31), region = 52 }
  0x27   : > { %s3553_s20 = smov (!%p305_p0, %s304_s20), 2  ;;  %s2690_s21 = smul.u32 1568, %s3551_s19  ;;  %v318_v0 = vlaneseq (!%p2390_p1)  ;;  %v2391_v1 = vld [vmem:[%s3545_s6] ss:$0 sm:$0xff] (!%p2390_p1)  ;;  %vm341_vm0 = vcmask (!%p2390_p1), 130048  }
  0x28   : > { %s2691_s22 = smul.u32 200, %s3553_s20  ;;  %350 = vst [vmem:[#allocation3] sm:$0xff] (!%p2390_p1), %v2391_v1  ;;  %v316_v3 = vld [vmem:[%s3544_s5] sm:$0xf] (!%p2390_p1) }
  0x29   : > { %s3189_s25 = scalar_lea.vmem %s3542_s3, %s2690_s21  ;;  %v319_v2 = vshrl.u32 (!%p2390_p1), %v318_v0, 7 }
  0x2a   : > { %s3194_s28 = scalar_lea.vmem %s3543_s4, %s2691_s22 }
  0x2b   : > { %v320_v4 = vsub.s32 (!%p2390_p1), 0, %v319_v2  ;;  %v324_v5 = vsub.s32 (!%p2390_p1), 1, %v319_v2  ;;  %v328_v6 = vsub.s32 (!%p2390_p1), 2, %v319_v2  ;;  %v332_v7 = vsub.s32 (!%p2390_p1), 3, %v319_v2 }
  0x2d   : > { %v321_v8 = vrot.slane %v316_v3, %v320_v4  ;;  %v325_v9 = vrot.slane %v316_v3, %v324_v5  ;;  %v329_v10 = vrot.slane %v316_v3, %v328_v6  ;;  %v333_v11 = vrot.slane %v316_v3, %v332_v7 }
  0x2f   : > { %338 = vst [vmem:[#allocation2] sm:$0xff] %v321_v8  ;;  %339 = vst [vmem:[#allocation2 + $0x8] sm:$0xff] %v325_v9 }
  0x30   : > { %340 = vst [vmem:[#allocation2 + $0x10] sm:$0xff] %v329_v10  ;;  %342 = vst.msk [vmem:[#allocation2 + $0x18] sm:$0xff] %vm341_vm0, %v333_v11 }
  0x31 PF: > { %p2392_p2 = scmp.ge.s32.totalorder %s3180_s18, 2 }
  0x32   : > { %v2713_v12 = vld [vmem:[%s3189_s25 + $0x4] ss:$16 sps:$4 sm:$0xff] (!%p2392_p2)   ;;  %v2717_v14 = vld [vmem:[%s3189_s25] ss:$16 sps:$4 sm:$0xff] (!%p2392_p2)   ;;  %v360_v60 = vld [vmem:[%s3541_s2 + $0x8] sm:$0xff] (!%p2392_p2)  ;;  %vm1563_vm1 = vcmask (!%p2392_p2), 130048  }
  0x33   : > { %354 = sbr.rel (%p2392_p2) target bundleno = 472 (0x1d8), region = 56  ;;  %v2715_v13 = vld [vmem:[%s3189_s25 + $0x204] ss:$16 sps:$4 sm:$0xff] (!%p2392_p2)   ;;  %1567 = vmatprep.subr.bf16.mxu0 (!%p2392_p2), %v2713_v12  ;;  %v2718_v15 = vld [vmem:[%s3189_s25 + $0x200] ss:$16 sps:$4 sm:$0xff] (!%p2392_p2)   ;;  %v3260_v63 = vcombine.high (!%p2392_p2), %v360_v60, %v360_v60 }
  0x34   : > { %1608 = vmatprep.subr.bf16.mxu1 (!%p2392_p2), %v2715_v13  ;;  %v2719_v16 = vld [vmem:[%s3189_s25 + $0x24] ss:$16 sps:$4 sm:$0xff] (!%p2392_p2)   ;;  %1568 = vmatpush1.bf16.msra.mxu0 (!%p2392_p2), %v2717_v14  ;;  %v2723_v18 = vld [vmem:[%s3189_s25 + $0x20] ss:$16 sps:$4 sm:$0xff] (!%p2392_p2)  }
  0x35   : > { %1609 = vmatpush1.bf16.msra.mxu1 (!%p2392_p2), %v2718_v15  ;;  %v2721_v17 = vld [vmem:[%s3189_s25 + $0x224] ss:$16 sps:$4 sm:$0xff] (!%p2392_p2)   ;;  %1569 = vmatprep.subr.bf16.mxu0 (!%p2392_p2), %v2719_v16  ;;  %v2724_v19 = vld [vmem:[%s3189_s25 + $0x220] ss:$16 sps:$4 sm:$0xff] (!%p2392_p2)  }
  0x36   : > { %1610 = vmatprep.subr.bf16.mxu1 (!%p2392_p2), %v2721_v17  ;;  %v2725_v20 = vld [vmem:[%s3189_s25 + $0x44] ss:$16 sps:$4 sm:$0xff] (!%p2392_p2)   ;;  %v2729_v22 = vld [vmem:[%s3189_s25 + $0x40] ss:$16 sps:$4 sm:$0xff] (!%p2392_p2)   ;;  %1640 = vmatprep.mubr.bf16.mxu1 (!%p2392_p2), %v3260_v63 }
  0x37   : > { %v2727_v21 = vld [vmem:[%s3189_s25 + $0x244] ss:$16 sps:$4 sm:$0xff] (!%p2392_p2)   ;;  %v2730_v23 = vld [vmem:[%s3189_s25 + $0x240] ss:$16 sps:$4 sm:$0xff] (!%p2392_p2)  }
  0x38   : > { %1570 = vmatpush1.bf16.msra.mxu0 (!%p2392_p2), %v2723_v18  ;;  %v2731_v24 = vld [vmem:[%s3189_s25 + $0x64] ss:$16 sps:$4 sm:$0xff] (!%p2392_p2)   ;;  %v2735_v26 = vld [vmem:[%s3189_s25 + $0x60] ss:$16 sps:$4 sm:$0xff] (!%p2392_p2)  }
  0x39   : > { %1611 = vmatpush1.bf16.msra.mxu1 (!%p2392_p2), %v2724_v19  ;;  %1571 = vmatprep.subr.bf16.mxu0 (!%p2392_p2), %v2725_v20  ;;  %v2733_v25 = vld [vmem:[%s3189_s25 + $0x264] ss:$16 sps:$4 sm:$0xff] (!%p2392_p2)   ;;  %v2736_v27 = vld [vmem:[%s3189_s25 + $0x260] ss:$16 sps:$4 sm:$0xff] (!%p2392_p2)   ;;  %v3284_v19 = vcombine.low (!%p2392_p2), %v360_v60, %v360_v60  ;;  %v2873_v60 = vld [vmem:[%s3189_s25 + $0x10c] ss:$16 sps:$4 sm:$0xff] (!%p2392_p2)  }
  0x3a   : > { %1612 = vmatprep.subr.bf16.mxu1 %v2727_v21  ;;  %v2737_v28 = vld [vmem:[%s3189_s25 + $0x84] ss:$16 sps:$4 sm:$0xff]   ;;  %v2741_v30 = vld [vmem:[%s3189_s25 + $0x80] ss:$16 sps:$4 sm:$0xff]  }
  0x3b   : > { %v2739_v29 = vld [vmem:[%s3189_s25 + $0x284] ss:$16 sps:$4 sm:$0xff]   ;;  %v2742_v31 = vld [vmem:[%s3189_s25 + $0x280] ss:$16 sps:$4 sm:$0xff]  }
  0x3c   : > { %1572 = vmatpush1.bf16.msra.mxu0 %v2729_v22  ;;  %v2743_v32 = vld [vmem:[%s3189_s25 + $0xa4] ss:$16 sps:$4 sm:$0xff]   ;;  %v2747_v34 = vld [vmem:[%s3189_s25 + $0xa0] ss:$16 sps:$4 sm:$0xff]  }
  0x3d   : > { %1613 = vmatpush1.bf16.msra.mxu1 %v2730_v23  ;;  %1573 = vmatprep.subr.bf16.mxu0 %v2731_v24  ;;  %v2745_v33 = vld [vmem:[%s3189_s25 + $0x2a4] ss:$16 sps:$4 sm:$0xff]   ;;  %v2748_v35 = vld [vmem:[%s3189_s25 + $0x2a0] ss:$16 sps:$4 sm:$0xff]   ;;  %v2824_v23 = vld [vmem:[%s3189_s25 + $0xc] ss:$16 sps:$4 sm:$0xff]  }
  0x3e   : > { %1614 = vmatprep.subr.bf16.mxu1 %v2733_v25  ;;  %v2749_v36 = vld [vmem:[%s3189_s25 + $0xc4] ss:$16 sps:$4 sm:$0xff]   ;;  %v2753_v38 = vld [vmem:[%s3189_s25 + $0xc0] ss:$16 sps:$4 sm:$0xff]   ;;  %v3113_v25 = vmov 0  }
  0x3f   : > { %v2751_v37 = vld [vmem:[%s3189_s25 + $0x2c4] ss:$16 sps:$4 sm:$0xff]   ;;  %v2754_v39 = vld [vmem:[%s3189_s25 + $0x2c0] ss:$16 sps:$4 sm:$0xff]  }
  0x40   : > { %1574 = vmatpush1.bf16.msra.mxu0 %v2735_v26  ;;  %v2755_v40 = vld [vmem:[%s3189_s25 + $0xe4] ss:$16 sps:$4 sm:$0xff]   ;;  %v2759_v42 = vld [vmem:[%s3189_s25 + $0xe0] ss:$16 sps:$4 sm:$0xff]  }
  0x41   : > { %1615 = vmatpush1.bf16.msra.mxu1 %v2736_v27  ;;  %1575 = vmatprep.subr.bf16.mxu0 %v2737_v28  ;;  %v2757_v41 = vld [vmem:[%s3189_s25 + $0x2e4] ss:$16 sps:$4 sm:$0xff]   ;;  %v2760_v43 = vld [vmem:[%s3189_s25 + $0x2e0] ss:$16 sps:$4 sm:$0xff]   ;;  %v2822_v27 = vld [vmem:[%s3189_s25 + $0x8] ss:$16 sps:$4 sm:$0xff]  }
  0x42   : > { %1616 = vmatprep.subr.bf16.mxu1 %v2739_v29  ;;  %v2761_v44 = vld [vmem:[%s3189_s25 + $0x104] ss:$16 sps:$4 sm:$0xff]   ;;  %v2765_v46 = vld [vmem:[%s3189_s25 + $0x100] ss:$16 sps:$4 sm:$0xff]   ;;  %v3300_v29 = vld [vmem:[%s3541_s2 + $0x18] ss:$0 sps:$4 sm:$0xff]  }
  0x43   : > { %v2763_v45 = vld [vmem:[%s3189_s25 + $0x304] ss:$16 sps:$4 sm:$0xff]   ;;  %v2766_v47 = vld [vmem:[%s3189_s25 + $0x300] ss:$16 sps:$4 sm:$0xff]  }
  0x44   : > { %1576 = vmatpush1.bf16.msra.mxu0 %v2741_v30  ;;  %v2767_v48 = vld [vmem:[%s3189_s25 + $0x124] ss:$16 sps:$4 sm:$0xff]   ;;  %v2771_v50 = vld [vmem:[%s3189_s25 + $0x120] ss:$16 sps:$4 sm:$0xff]   ;;  %v2831_v30 = vld [vmem:[%s3189_s25 + $0x2c] ss:$16 sps:$4 sm:$0xff]  }
  0x45   : > { %1617 = vmatpush1.bf16.msra.mxu1 %v2742_v31  ;;  %1577 = vmatprep.subr.bf16.mxu0 %v2743_v32  ;;  %v2769_v49 = vld [vmem:[%s3189_s25 + $0x324] ss:$16 sps:$4 sm:$0xff]   ;;  %v2772_v51 = vld [vmem:[%s3189_s25 + $0x320] ss:$16 sps:$4 sm:$0xff]   ;;  %v2829_v32 = vld [vmem:[%s3189_s25 + $0x28] ss:$16 sps:$4 sm:$0xff]  }
  0x46   : > { %1618 = vmatprep.subr.bf16.mxu1 %v2745_v33  ;;  %v2773_v52 = vld [vmem:[%s3189_s25 + $0x144] ss:$16 sps:$4 sm:$0xff]   ;;  %v2777_v54 = vld [vmem:[%s3189_s25 + $0x140] ss:$16 sps:$4 sm:$0xff]  }
  0x47   : > { %v2775_v53 = vld [vmem:[%s3189_s25 + $0x344] ss:$16 sps:$4 sm:$0xff]   ;;  %v2778_v55 = vld [vmem:[%s3189_s25 + $0x340] ss:$16 sps:$4 sm:$0xff]  }
  0x48   : > { %1578 = vmatpush1.bf16.msra.mxu0 %v2747_v34  ;;  %v2779_v56 = vld [vmem:[%s3189_s25 + $0x164] ss:$16 sps:$4 sm:$0xff]   ;;  %v2783_v61 = vld [vmem:[%s3189_s25 + $0x160] ss:$16 sps:$4 sm:$0xff]   ;;  %v2837_v34 = vld [vmem:[%s3189_s25 + $0x4c] ss:$16 sps:$4 sm:$0xff]  }
  0x49   : > { %1619 = vmatpush1.bf16.msra.mxu1 %v2748_v35  ;;  %1579 = vmatprep.subr.bf16.mxu0 %v2749_v36  ;;  %v2781_v57 = vld [vmem:[%s3189_s25 + $0x364] ss:$16 sps:$4 sm:$0xff]   ;;  %v2784_v62 = vld [vmem:[%s3189_s25 + $0x360] ss:$16 sps:$4 sm:$0xff]   ;;  %v2835_v36 = vld [vmem:[%s3189_s25 + $0x48] ss:$16 sps:$4 sm:$0xff]  }
  0x4a   : > { %1620 = vmatprep.subr.bf16.mxu1 %v2751_v37  ;;  %v359_v58 = vld [vmem:[%s3541_s2] sm:$0xff] }
  0x4b   : > { %v3253_v59 = vcombine.high %v359_v58, %v359_v58  ;;  %v2785_v0 = vld [vmem:[%s3189_s25 + $0x184] ss:$16 sps:$4 sm:$0xff]   ;;  %v2789_v2 = vld [vmem:[%s3189_s25 + $0x180] ss:$16 sps:$4 sm:$0xff]   ;;  %v3282_v18 = vcombine.low %v359_v58, %v359_v58  ;;  %v2865_v58 = vld [vmem:[%s3189_s25 + $0xe8] ss:$16 sps:$4 sm:$0xff]  }
  0x4c   : > { %1580 = vmatpush1.bf16.msra.mxu0 %v2753_v38  ;;  %v2787_v1 = vld [vmem:[%s3189_s25 + $0x384] ss:$16 sps:$4 sm:$0xff]   ;;  %v2790_v3 = vld [vmem:[%s3189_s25 + $0x380] ss:$16 sps:$4 sm:$0xff]   ;;  %v2843_v38 = vld [vmem:[%s3189_s25 + $0x6c] ss:$16 sps:$4 sm:$0xff]  }
  0x4d   : > { %1621 = vmatpush1.bf16.msra.mxu1 %v2754_v39  ;;  %1581 = vmatprep.subr.bf16.mxu0 %v2755_v40  ;;  %v2791_v4 = vld [vmem:[%s3189_s25 + $0x1a4] ss:$16 sps:$4 sm:$0xff]   ;;  %v2795_v6 = vld [vmem:[%s3189_s25 + $0x1a0] ss:$16 sps:$4 sm:$0xff]   ;;  %v2841_v40 = vld [vmem:[%s3189_s25 + $0x68] ss:$16 sps:$4 sm:$0xff]  }
  0x4e   : > { %1622 = vmatprep.subr.bf16.mxu1 %v2757_v41  ;;  %1599 = vmatprep.mubr.bf16.mxu0 %v3253_v59  ;;  %v2793_v5 = vld [vmem:[%s3189_s25 + $0x3a4] ss:$16 sps:$4 sm:$0xff]   ;;  %v2796_v7 = vld [vmem:[%s3189_s25 + $0x3a0] ss:$16 sps:$4 sm:$0xff]  }
  0x4f   : > { %v2797_v8 = vld [vmem:[%s3189_s25 + $0x1c4] ss:$16 sps:$4 sm:$0xff]   ;;  %v2801_v10 = vld [vmem:[%s3189_s25 + $0x1c0] ss:$16 sps:$4 sm:$0xff]  }
  0x50   : > { %1582 = vmatpush1.bf16.msra.mxu0 %v2759_v42  ;;  %v2799_v9 = vld [vmem:[%s3189_s25 + $0x3c4] ss:$16 sps:$4 sm:$0xff]   ;;  %v2802_v11 = vld [vmem:[%s3189_s25 + $0x3c0] ss:$16 sps:$4 sm:$0xff]   ;;  %v2849_v42 = vld [vmem:[%s3189_s25 + $0x8c] ss:$16 sps:$4 sm:$0xff]  }
  0x51   : > { %1623 = vmatpush1.bf16.msra.mxu1 %v2760_v43  ;;  %1583 = vmatprep.subr.bf16.mxu0 %v2761_v44  ;;  %v2803_v12 = vld [vmem:[%s3189_s25 + $0x1e4] ss:$16 sps:$4 sm:$0xff]   ;;  %v2807_v14 = vld [vmem:[%s3189_s25 + $0x1e0] ss:$16 sps:$4 sm:$0xff]  }
  0x52   : > { %1624 = vmatprep.subr.bf16.mxu1 %v2763_v45  ;;  %v2805_v13 = vld [vmem:[%s3189_s25 + $0x3e4] ss:$16 sps:$4 sm:$0xff]   ;;  %v2808_v15 = vld [vmem:[%s3189_s25 + $0x3e0] ss:$16 sps:$4 sm:$0xff]  }
  0x53   : > { %v2815_v16 = vld [vmem:[%s3189_s25 + $0x404] ss:$16 sps:$4 sm:$0xff]   ;;  %v2813_v20 = vld [vmem:[%s3189_s25 + $0x400] ss:$16 sps:$4 sm:$0xff]  }
  0x54   : > { %1584 = vmatpush1.bf16.msra.mxu0 %v2765_v46  ;;  %v2818_v17 = vld [vmem:[%s3189_s25 + $0x604] ss:$16 sps:$4 sm:$0xff]   ;;  %v2816_v21 = vld [vmem:[%s3189_s25 + $0x600] ss:$16 sps:$4 sm:$0xff]   ;;  %v2847_v46 = vld [vmem:[%s3189_s25 + $0x88] ss:$16 sps:$4 sm:$0xff]  }
  0x55   : > { %1625 = vmatpush1.bf16.msra.mxu1 %v2766_v47  ;;  %1585 = vmatprep.subr.bf16.mxu0 %v2767_v48  ;;  %v2821_v22 = vld [vmem:[%s3189_s25 + $0x424] ss:$16 sps:$4 sm:$0xff]   ;;  %v2819_v24 = vld [vmem:[%s3189_s25 + $0x420] ss:$16 sps:$4 sm:$0xff]   ;;  %v2855_v48 = vld [vmem:[%s3189_s25 + $0xac] ss:$16 sps:$4 sm:$0xff]  }
  0x56   : > { %1626 = vmatprep.subr.bf16.mxu1 %v2769_v49  ;;  %v2827_v26 = vld [vmem:[%s3189_s25 + $0x444] ss:$16 sps:$4 sm:$0xff]   ;;  %v2825_v28 = vld [vmem:[%s3189_s25 + $0x440] ss:$16 sps:$4 sm:$0xff]  }
  0x57   : > { %v2834_v31 = vld [vmem:[%s3189_s25 + $0x464] ss:$16 sps:$4 sm:$0xff]   ;;  %v2832_v33 = vld [vmem:[%s3189_s25 + $0x460] ss:$16 sps:$4 sm:$0xff]  }
  0x58   : > { %1586 = vmatpush1.bf16.msra.mxu0 %v2771_v50  ;;  %v2840_v35 = vld [vmem:[%s3189_s25 + $0x484] ss:$16 sps:$4 sm:$0xff]   ;;  %v2838_v37 = vld [vmem:[%s3189_s25 + $0x480] ss:$16 sps:$4 sm:$0xff]   ;;  %v2853_v50 = vld [vmem:[%s3189_s25 + $0xa8] ss:$16 sps:$4 sm:$0xff]  }
  0x59   : > { %1627 = vmatpush1.bf16.msra.mxu1 %v2772_v51  ;;  %1587 = vmatprep.subr.bf16.mxu0 %v2773_v52  ;;  %v2846_v39 = vld [vmem:[%s3189_s25 + $0x4a4] ss:$16 sps:$4 sm:$0xff]   ;;  %v2844_v41 = vld [vmem:[%s3189_s25 + $0x4a0] ss:$16 sps:$4 sm:$0xff]   ;;  %v2861_v52 = vld [vmem:[%s3189_s25 + $0xcc] ss:$16 sps:$4 sm:$0xff]  }
  0x5a   : > { %1628 = vmatprep.subr.bf16.mxu1 %v2775_v53  ;;  %v2852_v43 = vld [vmem:[%s3189_s25 + $0x4c4] ss:$16 sps:$4 sm:$0xff]   ;;  %v2850_v47 = vld [vmem:[%s3189_s25 + $0x4c0] ss:$16 sps:$4 sm:$0xff]  }
  0x5b   : > { %v3322_v44 = vld [vmem:[%s3541_s2 + $0x10] sm:$0xff] }
  0x5c   : > { %1588 = vmatpush1.bf16.msra.mxu0 %v2777_v54  ;;  %v3326_v45 = vcombine.high %v3322_v44, %v3322_v44  ;;  %v2858_v49 = vld [vmem:[%s3189_s25 + $0x4e4] ss:$16 sps:$4 sm:$0xff]   ;;  %v2856_v51 = vld [vmem:[%s3189_s25 + $0x4e0] ss:$16 sps:$4 sm:$0xff]   ;;  %v2859_v54 = vld [vmem:[%s3189_s25 + $0xc8] ss:$16 sps:$4 sm:$0xff]  }
  0x5d   : > { %1629 = vmatpush1.bf16.msra.mxu1 %v2778_v55  ;;  %1589 = vmatprep.subr.bf16.mxu0 %v2779_v56  ;;  %v2864_v53 = vld [vmem:[%s3189_s25 + $0x504] ss:$16 sps:$4 sm:$0xff]   ;;  %v2862_v55 = vld [vmem:[%s3189_s25 + $0x500] ss:$16 sps:$4 sm:$0xff]   ;;  %v2867_v56 = vld [vmem:[%s3189_s25 + $0xec] ss:$16 sps:$4 sm:$0xff]  }
  0x5e   : > { %1630 = vmatprep.subr.bf16.mxu1 %v2781_v57  ;;  %v2870_v57 = vld [vmem:[%s3189_s25 + $0x524] ss:$16 sps:$4 sm:$0xff]  }
  0x60   : > { %1590 = vmatpush1.bf16.msra.mxu0 %v2783_v61  ;;  %v2876_v61 = vld [vmem:[%s3189_s25 + $0x544] ss:$16 sps:$4 sm:$0xff]  }
  0x61   : > { %1631 = vmatpush1.bf16.msra.mxu1 %v2784_v62  ;;  %1591 = vmatprep.subr.bf16.mxu0 %v2785_v0  ;;  %v2871_v62 = vld [vmem:[%s3189_s25 + $0x108] ss:$16 sps:$4 sm:$0xff]   ;;  %v2874_v0 = vld [vmem:[%s3189_s25 + $0x540] ss:$16 sps:$4 sm:$0xff]  }
  0x62   : > { %1632 = vmatprep.subr.bf16.mxu1 %v2787_v1  ;;  %v2879_v1 = vld [vmem:[%s3189_s25 + $0x12c] ss:$16 sps:$4 sm:$0xff]  }
  0x64   : > { %1592 = vmatpush1.bf16.msra.mxu0 %v2789_v2  ;;  %v2882_v2 = vld [vmem:[%s3189_s25 + $0x564] ss:$16 sps:$4 sm:$0xff]  }
  0x65   : > { %1633 = vmatpush1.bf16.msra.mxu1 %v2790_v3  ;;  %1593 = vmatprep.subr.bf16.mxu0 %v2791_v4  ;;  %v2877_v3 = vld [vmem:[%s3189_s25 + $0x128] ss:$16 sps:$4 sm:$0xff]   ;;  %v2880_v4 = vld [vmem:[%s3189_s25 + $0x560] ss:$16 sps:$4 sm:$0xff]  }
  0x66   : > { %1634 = vmatprep.subr.bf16.mxu1 %v2793_v5  ;;  %v2885_v5 = vld [vmem:[%s3189_s25 + $0x14c] ss:$16 sps:$4 sm:$0xff]  }
  0x68   : > { %1594 = vmatpush1.bf16.msra.mxu0 %v2795_v6  ;;  %v2888_v6 = vld [vmem:[%s3189_s25 + $0x584] ss:$16 sps:$4 sm:$0xff]  }
  0x69   : > { %1635 = vmatpush1.bf16.msra.mxu1 %v2796_v7  ;;  %1595 = vmatprep.subr.bf16.mxu0 %v2797_v8  ;;  %v2883_v7 = vld [vmem:[%s3189_s25 + $0x148] ss:$16 sps:$4 sm:$0xff]   ;;  %v2886_v8 = vld [vmem:[%s3189_s25 + $0x580] ss:$16 sps:$4 sm:$0xff]  }
  0x6a   : > { %1636 = vmatprep.subr.bf16.mxu1 %v2799_v9  ;;  %v2891_v9 = vld [vmem:[%s3189_s25 + $0x16c] ss:$16 sps:$4 sm:$0xff]  }
  0x6c   : > { %1596 = vmatpush1.bf16.msra.mxu0 %v2801_v10  ;;  %v2894_v10 = vld [vmem:[%s3189_s25 + $0x5a4] ss:$16 sps:$4 sm:$0xff]  }
  0x6d   : > { %1637 = vmatpush1.bf16.msra.mxu1 %v2802_v11  ;;  %1597 = vmatprep.subr.bf16.mxu0 %v2803_v12  ;;  %v2889_v11 = vld [vmem:[%s3189_s25 + $0x168] ss:$16 sps:$4 sm:$0xff]   ;;  %v2892_v12 = vld [vmem:[%s3189_s25 + $0x5a0] ss:$16 sps:$4 sm:$0xff]  }
  0x6e   : > { %1638 = vmatprep.subr.bf16.mxu1 %v2805_v13  ;;  %v2897_v13 = vld [vmem:[%s3189_s25 + $0x18c] ss:$16 sps:$4 sm:$0xff]  }
  0x70   : > { %1598 = vmatpush1.bf16.msra.mxu0 %v2807_v14  ;;  %v2900_v14 = vld [vmem:[%s3189_s25 + $0x5c4] ss:$16 sps:$4 sm:$0xff]  }
  0x71   : > { %1639 = vmatpush1.bf16.msra.mxu1 %v2808_v15  ;;  %1649 = vmatprep.subr.bf16.mxu0 %v2815_v16  ;;  %v2895_v15 = vld [vmem:[%s3189_s25 + $0x188] ss:$16 sps:$4 sm:$0xff]   ;;  %v2898_v16 = vld [vmem:[%s3189_s25 + $0x5c0] ss:$16 sps:$4 sm:$0xff]  }
  0x72   : > { %1690 = vmatprep.subr.bf16.mxu1 %v2818_v17  ;;  %v2903_v17 = vld [vmem:[%s3189_s25 + $0x1ac] ss:$16 sps:$4 sm:$0xff]  }
  0x73   : > { %1600 = vmatmul.mubr.bf16.vlgmr.msra.gmra.mrb[0].mxu0 %v3282_v18 }
  0x74   : > { %1641 = vmatmul.mubr.bf16.vlgmr.msra.gmra.mrb[0].mxu1 %v3284_v19  ;;  %1650 = vmatpush1.bf16.msra.mxu0 %v2813_v20  ;;  %v2906_v20 = vld [vmem:[%s3189_s25 + $0x5e4] ss:$16 sps:$4 sm:$0xff]  }
  0x75   : > { %1691 = vmatpush1.bf16.msra.mxu1 %v2816_v21  ;;  %1651 = vmatprep.subr.bf16.mxu0 %v2821_v22  ;;  %v2901_v21 = vld [vmem:[%s3189_s25 + $0x1a8] ss:$16 sps:$4 sm:$0xff]   ;;  %v2904_v22 = vld [vmem:[%s3189_s25 + $0x5e0] ss:$16 sps:$4 sm:$0xff]  }
  0x76   : > { %1722 = vmatprep.mubr.bf16.mxu1 %v3113_v25  ;;  %1731 = vmatprep.subr.bf16.mxu1 %v2824_v23  ;;  %v2911_v23 = vld [vmem:[%s3189_s25 + $0x1cc] ss:$16 sps:$4 sm:$0xff]  }
  0x77   : > { %1681 = vmatprep.mubr.bf16.mxu0 %v3326_v45 }
  0x78   : > { %1652 = vmatpush1.bf16.msra.mxu0 %v2819_v24  ;;  %v2914_v24 = vld [vmem:[%s3189_s25 + $0x20c] ss:$16 sps:$4 sm:$0xff]  }
  0x79   : > { %1653 = vmatprep.subr.bf16.mxu0 %v2827_v26  ;;  %v3371_v26 = vcombine.low %v3322_v44, %v3322_v44  ;;  %v2941_v44 = vld [vmem:[%s3189_s25 + $0x46c] ss:$16 sps:$4 sm:$0xff]  }
  0x7c   : > { %2596 = vmatmul.mubr.msk.bf16.vlgmr.msra.gmra.mrb[4].mxu1 %vm1563_vm1, %v3300_v29  ;;  %1654 = vmatpush1.bf16.msra.mxu0 %v2825_v28  ;;  %v2912_v28 = vld [vmem:[%s3189_s25 + $0x208] ss:$16 sps:$4 sm:$0xff]  }
  0x7d   : > { %1732 = vmatpush1.bf16.msra.mxu1 %v2822_v27  ;;  %1655 = vmatprep.subr.bf16.mxu0 %v2834_v31  ;;  %v2909_v27 = vld [vmem:[%s3189_s25 + $0x1c8] ss:$16 sps:$4 sm:$0xff]   ;;  %v2920_v31 = vld [vmem:[%s3189_s25 + $0x22c] ss:$16 sps:$4 sm:$0xff]  }
  0x7e   : > { %1733 = vmatprep.subr.bf16.mxu1 %v2831_v30  ;;  %1763 = vmatprep.mubr.bf16.mxu1 %v3253_v59  ;;  %v2868_v59 = vld [vmem:[%s3189_s25 + $0x520] ss:$16 sps:$4 sm:$0xff]   ;;  %v2917_v30 = vld [vmem:[%s3189_s25 + $0x1ec] ss:$16 sps:$4 sm:$0xff]  }
  0x80   : > { %1656 = vmatpush1.bf16.msra.mxu0 %v2832_v33  ;;  %v2918_v33 = vld [vmem:[%s3189_s25 + $0x228] ss:$16 sps:$4 sm:$0xff]  }
  0x81   : > { %1734 = vmatpush1.bf16.msra.mxu1 %v2829_v32  ;;  %1657 = vmatprep.subr.bf16.mxu0 %v2840_v35  ;;  %v2915_v32 = vld [vmem:[%s3189_s25 + $0x1e8] ss:$16 sps:$4 sm:$0xff]   ;;  %v2926_v35 = vld [vmem:[%s3189_s25 + $0x24c] ss:$16 sps:$4 sm:$0xff]  }
  0x82   : > { %1735 = vmatprep.subr.bf16.mxu1 %v2837_v34  ;;  %v2923_v34 = vld [vmem:[%s3189_s25 + $0x40c] ss:$16 sps:$4 sm:$0xff]  }
  0x84   : > { %1658 = vmatpush1.bf16.msra.mxu0 %v2838_v37  ;;  %v2924_v37 = vld [vmem:[%s3189_s25 + $0x248] ss:$16 sps:$4 sm:$0xff]  }
  0x85   : > { %1736 = vmatpush1.bf16.msra.mxu1 %v2835_v36  ;;  %1659 = vmatprep.subr.bf16.mxu0 %v2846_v39  ;;  %v2921_v36 = vld [vmem:[%s3189_s25 + $0x408] ss:$16 sps:$4 sm:$0xff]   ;;  %v2932_v39 = vld [vmem:[%s3189_s25 + $0x26c] ss:$16 sps:$4 sm:$0xff]  }
  0x86   : > { %1737 = vmatprep.subr.bf16.mxu1 %v2843_v38  ;;  %v2929_v38 = vld [vmem:[%s3189_s25 + $0x42c] ss:$16 sps:$4 sm:$0xff]  }
  0x88   : > { %1660 = vmatpush1.bf16.msra.mxu0 %v2844_v41  ;;  %v2935_v41 = vld [vmem:[%s3189_s25 + $0x44c] ss:$16 sps:$4 sm:$0xff]  }
  0x89   : > { %1738 = vmatpush1.bf16.msra.mxu1 %v2841_v40  ;;  %1661 = vmatprep.subr.bf16.mxu0 %v2852_v43  ;;  %v2927_v40 = vld [vmem:[%s3189_s25 + $0x428] ss:$16 sps:$4 sm:$0xff]  }
  0x8a   : > { %1739 = vmatprep.subr.bf16.mxu1 %v2849_v42  ;;  %v2938_v42 = vld [vmem:[%s3189_s25 + $0x28c] ss:$16 sps:$4 sm:$0xff]   ;;  %v2933_v43 = vld [vmem:[%s3189_s25 + $0x448] ss:$16 sps:$4 sm:$0xff]  }
  0x8c   : > { %1662 = vmatpush1.bf16.msra.mxu0 %v2850_v47  ;;  %v2939_v47 = vld [vmem:[%s3189_s25 + $0x468] ss:$16 sps:$4 sm:$0xff]  }
  0x8d   : > { %1740 = vmatpush1.bf16.msra.mxu1 %v2847_v46  ;;  %1663 = vmatprep.subr.bf16.mxu0 %v2858_v49  ;;  %v2944_v46 = vld [vmem:[%s3189_s25 + $0x2ac] ss:$16 sps:$4 sm:$0xff]  }
  0x8e   : > { %1741 = vmatprep.subr.bf16.mxu1 %v2855_v48  ;;  %v2942_v48 = vld [vmem:[%s3189_s25 + $0x2a8] ss:$16 sps:$4 sm:$0xff]   ;;  %v2950_v49 = vld [vmem:[%s3189_s25 + $0x2cc] ss:$16 sps:$4 sm:$0xff]  }
  0x90   : > { %1664 = vmatpush1.bf16.msra.mxu0 %v2856_v51  ;;  %v2948_v51 = vld [vmem:[%s3189_s25 + $0x2c8] ss:$16 sps:$4 sm:$0xff]  }
  0x91   : > { %1742 = vmatpush1.bf16.msra.mxu1 %v2853_v50  ;;  %1665 = vmatprep.subr.bf16.mxu0 %v2864_v53  ;;  %v2945_v50 = vld [vmem:[%s3189_s25 + $0x488] ss:$16 sps:$4 sm:$0xff]   ;;  %v2956_v53 = vld [vmem:[%s3189_s25 + $0x2ec] ss:$16 sps:$4 sm:$0xff]  }
  0x92   : > { %1743 = vmatprep.subr.bf16.mxu1 %v2861_v52  ;;  %v2953_v52 = vld [vmem:[%s3189_s25 + $0x4ac] ss:$16 sps:$4 sm:$0xff]  }
  0x94   : > { %1666 = vmatpush1.bf16.msra.mxu0 %v2862_v55  ;;  %v2954_v55 = vld [vmem:[%s3189_s25 + $0x2e8] ss:$16 sps:$4 sm:$0xff]  }
  0x95   : > { %1744 = vmatpush1.bf16.msra.mxu1 %v2859_v54  ;;  %1667 = vmatprep.subr.bf16.mxu0 %v2870_v57  ;;  %v2951_v54 = vld [vmem:[%s3189_s25 + $0x4a8] ss:$16 sps:$4 sm:$0xff]   ;;  %v2962_v57 = vld [vmem:[%s3189_s25 + $0x30c] ss:$16 sps:$4 sm:$0xff]  }
  0x96   : > { %1745 = vmatprep.subr.bf16.mxu1 %v2867_v56  ;;  %v2959_v56 = vld [vmem:[%s3189_s25 + $0x4cc] ss:$16 sps:$4 sm:$0xff]  }
  0x98   : > { %1668 = vmatpush1.bf16.msra.mxu0 %v2868_v59  ;;  %v2960_v59 = vld [vmem:[%s3189_s25 + $0x308] ss:$16 sps:$4 sm:$0xff]  }
  0x99   : > { %1746 = vmatpush1.bf16.msra.mxu1 %v2865_v58  ;;  %1669 = vmatprep.subr.bf16.mxu0 %v2876_v61  ;;  %v2957_v58 = vld [vmem:[%s3189_s25 + $0x4c8] ss:$16 sps:$4 sm:$0xff]   ;;  %v2968_v61 = vld [vmem:[%s3189_s25 + $0x32c] ss:$16 sps:$4 sm:$0xff]  }
  0x9a   : > { %1747 = vmatprep.subr.bf16.mxu1 %v2873_v60  ;;  %v2965_v60 = vld [vmem:[%s3189_s25 + $0x4ec] ss:$16 sps:$4 sm:$0xff]  }
  0x9c   : > { %1670 = vmatpush1.bf16.msra.mxu0 %v2874_v0  ;;  %v2966_v0 = vld [vmem:[%s3189_s25 + $0x328] ss:$16 sps:$4 sm:$0xff]  }
  0x9d   : > { %1748 = vmatpush1.bf16.msra.mxu1 %v2871_v62  ;;  %1671 = vmatprep.subr.bf16.mxu0 %v2882_v2  ;;  %v2963_v62 = vld [vmem:[%s3189_s25 + $0x4e8] ss:$16 sps:$4 sm:$0xff]   ;;  %v2974_v2 = vld [vmem:[%s3189_s25 + $0x34c] ss:$16 sps:$4 sm:$0xff]  }
  0x9e   : > { %1749 = vmatprep.subr.bf16.mxu1 %v2879_v1  ;;  %v2971_v1 = vld [vmem:[%s3189_s25 + $0x50c] ss:$16 sps:$4 sm:$0xff]  }
  0xa0   : > { %1672 = vmatpush1.bf16.msra.mxu0 %v2880_v4  ;;  %v2972_v4 = vld [vmem:[%s3189_s25 + $0x348] ss:$16 sps:$4 sm:$0xff]  }
  0xa1   : > { %1750 = vmatpush1.bf16.msra.mxu1 %v2877_v3  ;;  %1673 = vmatprep.subr.bf16.mxu0 %v2888_v6  ;;  %v2969_v3 = vld [vmem:[%s3189_s25 + $0x508] ss:$16 sps:$4 sm:$0xff]   ;;  %v2980_v6 = vld [vmem:[%s3189_s25 + $0x36c] ss:$16 sps:$4 sm:$0xff]  }
  0xa2   : > { %1751 = vmatprep.subr.bf16.mxu1 %v2885_v5  ;;  %v2977_v5 = vld [vmem:[%s3189_s25 + $0x52c] ss:$16 sps:$4 sm:$0xff]  }
  0xa4   : > { %1674 = vmatpush1.bf16.msra.mxu0 %v2886_v8  ;;  %v2978_v8 = vld [vmem:[%s3189_s25 + $0x368] ss:$16 sps:$4 sm:$0xff]  }
  0xa5   : > { %1752 = vmatpush1.bf16.msra.mxu1 %v2883_v7  ;;  %1675 = vmatprep.subr.bf16.mxu0 %v2894_v10  ;;  %v2975_v7 = vld [vmem:[%s3189_s25 + $0x528] ss:$16 sps:$4 sm:$0xff]   ;;  %v2986_v10 = vld [vmem:[%s3189_s25 + $0x38c] ss:$16 sps:$4 sm:$0xff]  }
  0xa6   : > { %1753 = vmatprep.subr.bf16.mxu1 %v2891_v9  ;;  %v2983_v9 = vld [vmem:[%s3189_s25 + $0x54c] ss:$16 sps:$4 sm:$0xff]  }
  0xa8   : > { %1676 = vmatpush1.bf16.msra.mxu0 %v2892_v12  ;;  %v2984_v12 = vld [vmem:[%s3189_s25 + $0x388] ss:$16 sps:$4 sm:$0xff]  }
  0xa9   : > { %1754 = vmatpush1.bf16.msra.mxu1 %v2889_v11  ;;  %1677 = vmatprep.subr.bf16.mxu0 %v2900_v14  ;;  %v2981_v11 = vld [vmem:[%s3189_s25 + $0x548] ss:$16 sps:$4 sm:$0xff]   ;;  %v2992_v14 = vld [vmem:[%s3189_s25 + $0x3ac] ss:$16 sps:$4 sm:$0xff]  }
  0xaa   : > { %1755 = vmatprep.subr.bf16.mxu1 %v2897_v13  ;;  %v2989_v13 = vld [vmem:[%s3189_s25 + $0x56c] ss:$16 sps:$4 sm:$0xff]  }
  0xac   : > { %1678 = vmatpush1.bf16.msra.mxu0 %v2898_v16  ;;  %v2990_v16 = vld [vmem:[%s3189_s25 + $0x3a8] ss:$16 sps:$4 sm:$0xff]  }
  0xad   : > { %1756 = vmatpush1.bf16.msra.mxu1 %v2895_v15  ;;  %1679 = vmatprep.subr.bf16.mxu0 %v2906_v20  ;;  %v2987_v15 = vld [vmem:[%s3189_s25 + $0x568] ss:$16 sps:$4 sm:$0xff]   ;;  %v2998_v20 = vld [vmem:[%s3189_s25 + $0x3cc] ss:$16 sps:$4 sm:$0xff]  }
  0xae   : > { %1757 = vmatprep.subr.bf16.mxu1 %v2903_v17  ;;  %v2995_v17 = vld [vmem:[%s3189_s25 + $0x58c] ss:$16 sps:$4 sm:$0xff]  }
  0xb0   : > { %1680 = vmatpush1.bf16.msra.mxu0 %v2904_v22  ;;  %v2996_v22 = vld [vmem:[%s3189_s25 + $0x3c8] ss:$16 sps:$4 sm:$0xff]  }
  0xb1   : > { %1758 = vmatpush1.bf16.msra.mxu1 %v2901_v21  ;;  %1772 = vmatprep.subr.bf16.mxu0 %v2914_v24  ;;  %v2993_v21 = vld [vmem:[%s3189_s25 + $0x588] ss:$16 sps:$4 sm:$0xff]   ;;  %v3004_v24 = vld [vmem:[%s3189_s25 + $0x3ec] ss:$16 sps:$4 sm:$0xff]  }
  0xb2   : > { %1759 = vmatprep.subr.bf16.mxu1 %v2911_v23  ;;  %v3001_v23 = vld [vmem:[%s3189_s25 + $0x5ac] ss:$16 sps:$4 sm:$0xff]  }
  0xb3   : > { %1682 = vmatmul.mubr.bf16.vlgmr.msra.gmra.mrb[4].mxu0 %v3371_v26 }
  0xb4   : > { %1773 = vmatpush1.bf16.msra.mxu0 %v2912_v28  ;;  %1804 = vmatprep.mubr.bf16.mxu0 %v3260_v63  ;;  %v2930_v63 = vld [vmem:[%s3189_s25 + $0x268] ss:$16 sps:$4 sm:$0xff]  }
  0xb5   : > { %1760 = vmatpush1.bf16.msra.mxu1 %v2909_v27  ;;  %1774 = vmatprep.subr.bf16.mxu0 %v2920_v31  ;;  %v2999_v27 = vld [vmem:[%s3189_s25 + $0x5a8] ss:$16 sps:$4 sm:$0xff]   ;;  %v3010_v31 = vld [vmem:[%s3189_s25 + $0x60c] ss:$16 sps:$4 sm:$0xff]  }
  0xb6   : > { %1761 = vmatprep.subr.bf16.mxu1 %v2917_v30  ;;  %v3002_v28 = vld [vmem:[%s3189_s25 + $0x3e8] ss:$16 sps:$4 sm:$0xff]   ;;  %v3007_v30 = vld [vmem:[%s3189_s25 + $0x5cc] ss:$16 sps:$4 sm:$0xff]  }
  0xb8   : > { %1775 = vmatpush1.bf16.msra.mxu0 %v2918_v33  ;;  %v3008_v33 = vld [vmem:[%s3189_s25 + $0x608] ss:$16 sps:$4 sm:$0xff]  }
  0xb9   : > { %1762 = vmatpush1.bf16.msra.mxu1 %v2915_v32  ;;  %1776 = vmatprep.subr.bf16.mxu0 %v2926_v35  ;;  %v3005_v32 = vld [vmem:[%s3189_s25 + $0x5c8] ss:$16 sps:$4 sm:$0xff]  }
  0xba   : > { %1813 = vmatprep.subr.bf16.mxu1 %v2923_v34  ;;  %v3013_v34 = vld [vmem:[%s3189_s25 + $0x5ec] ss:$16 sps:$4 sm:$0xff]   ;;  %v3011_v35 = vld [vmem:[%s3189_s25 + $0x5e8] ss:$16 sps:$4 sm:$0xff]  }
  0xbc   : > { %1764 = vmatmul.mubr.bf16.vlgmr.msra.gmra.mrb[8].mxu1 %v3282_v18  ;;  %1777 = vmatpush1.bf16.msra.mxu0 %v2924_v37  ;;  %v2936_v18 = vld [vmem:[%s3189_s25 + $0x288] ss:$16 sps:$4 sm:$0xff]  }
  0xbd   : > { %1814 = vmatpush1.bf16.msra.mxu1 %v2921_v36  ;;  %1778 = vmatprep.subr.bf16.mxu0 %v2932_v39 }
  0xbe   : > { %1815 = vmatprep.subr.bf16.mxu1 %v2929_v38  ;;  %1845 = vmatprep.mubr.bf16.mxu1 %v3326_v45  ;;  %v2947_v45 = vld [vmem:[%s3189_s25 + $0x48c] ss:$16 sps:$4 sm:$0xff]  }
  0xc0   : > { %1779 = vmatpush1.bf16.msra.mxu0 %v2930_v63 }
  0xc1   : > { %1816 = vmatpush1.bf16.msra.mxu1 %v2927_v40  ;;  %1780 = vmatprep.subr.bf16.mxu0 %v2938_v42 }
  0xc2   : > { %1817 = vmatprep.subr.bf16.mxu1 %v2935_v41 }
  0xc4   : > { %1781 = vmatpush1.bf16.msra.mxu0 %v2936_v18 }
  0xc5   : > { %1818 = vmatpush1.bf16.msra.mxu1 %v2933_v43  ;;  %1782 = vmatprep.subr.bf16.mxu0 %v2944_v46 }
  0xc6   : > { %1819 = vmatprep.subr.bf16.mxu1 %v2941_v44 }
  0xc8   : > { %1783 = vmatpush1.bf16.msra.mxu0 %v2942_v48 }
  0xc9   : > { %1820 = vmatpush1.bf16.msra.mxu1 %v2939_v47  ;;  %1784 = vmatprep.subr.bf16.mxu0 %v2950_v49 }
  0xca   : > { %1821 = vmatprep.subr.bf16.mxu1 %v2947_v45  ;;  %v355_v45 = vld [vmem:[#allocation2] sm:$0xff] }
  0xcc   : > { %1785 = vmatpush1.bf16.msra.mxu0 %v2948_v51  ;;  %v356_v51 = vld [vmem:[#allocation2 + $0x8] sm:$0xff] }
  0xcd   : > { %1822 = vmatpush1.bf16.msra.mxu1 %v2945_v50  ;;  %1786 = vmatprep.subr.bf16.mxu0 %v2956_v53 }
  0xce   : > { %1823 = vmatprep.subr.bf16.mxu1 %v2953_v52 }
  0xd0   : > { %1787 = vmatpush1.bf16.msra.mxu0 %v2954_v55 }
  0xd1   : > { %1824 = vmatpush1.bf16.msra.mxu1 %v2951_v54  ;;  %1788 = vmatprep.subr.bf16.mxu0 %v2962_v57 }
  0xd2   : > { %1825 = vmatprep.subr.bf16.mxu1 %v2959_v56 }
  0xd4   : > { %1789 = vmatpush1.bf16.msra.mxu0 %v2960_v59 }
  0xd5   : > { %1826 = vmatpush1.bf16.msra.mxu1 %v2957_v58  ;;  %1790 = vmatprep.subr.bf16.mxu0 %v2968_v61 }
  0xd6   : > { %1827 = vmatprep.subr.bf16.mxu1 %v2965_v60 }
  0xd8   : > { %1791 = vmatpush1.bf16.msra.mxu0 %v2966_v0 }
  0xd9   : > { %1828 = vmatpush1.bf16.msra.mxu1 %v2963_v62  ;;  %1792 = vmatprep.subr.bf16.mxu0 %v2974_v2 }
  0xda   : > { %1829 = vmatprep.subr.bf16.mxu1 %v2971_v1 }
  0xdc   : > { %1793 = vmatpush1.bf16.msra.mxu0 %v2972_v4 }
  0xdd   : > { %1830 = vmatpush1.bf16.msra.mxu1 %v2969_v3  ;;  %1794 = vmatprep.subr.bf16.mxu0 %v2980_v6 }
  0xde   : > { %1831 = vmatprep.subr.bf16.mxu1 %v2977_v5 }
  0xe0   : > { %1795 = vmatpush1.bf16.msra.mxu0 %v2978_v8 }
  0xe1   : > { %1832 = vmatpush1.bf16.msra.mxu1 %v2975_v7  ;;  %1796 = vmatprep.subr.bf16.mxu0 %v2986_v10 }
  0xe2   : > { %1833 = vmatprep.subr.bf16.mxu1 %v2983_v9  ;;  %v357_v9 = vld [vmem:[#allocation2 + $0x10] sm:$0xff] }
  0xe4   : > { %1797 = vmatpush1.bf16.msra.mxu0 %v2984_v12 }
  0xe5   : > { %1834 = vmatpush1.bf16.msra.mxu1 %v2981_v11  ;;  %1798 = vmatprep.subr.bf16.mxu0 %v2992_v14 }
  0xe6   : > { %1835 = vmatprep.subr.bf16.mxu1 %v2989_v13  ;;  %v358_v13 = vld [vmem:[#allocation2 + $0x18] sm:$0xff] }
  0xe8   : > { %1799 = vmatpush1.bf16.msra.mxu0 %v2990_v16 }
  0xe9   : > { %1836 = vmatpush1.bf16.msra.mxu1 %v2987_v15  ;;  %1800 = vmatprep.subr.bf16.mxu0 %v2998_v20 }
  0xea   : > { %1837 = vmatprep.subr.bf16.mxu1 %v2995_v17 }
  0xec   : > { %1801 = vmatpush1.bf16.msra.mxu0 %v2996_v22 }
  0xed   : > { %1838 = vmatpush1.bf16.msra.mxu1 %v2993_v21  ;;  %1802 = vmatprep.subr.bf16.mxu0 %v3004_v24 }
  0xee   : > { %1839 = vmatprep.subr.bf16.mxu1 %v3001_v23 }
  0xf0   : > { %1803 = vmatpush1.bf16.msra.mxu0 %v3002_v28 }
  0xf1   : > { %1840 = vmatpush1.bf16.msra.mxu1 %v2999_v27  ;;  %1854 = vmatprep.subr.bf16.mxu0 %v3010_v31 }
  0xf2   : > { %1841 = vmatprep.subr.bf16.mxu1 %v3007_v30 }
  0xf3   : > { %1805 = vmatmul.mubr.bf16.vlgmr.msra.gmra.mrb[8].mxu0 %v3284_v19 }
  0xf4   : > { %1855 = vmatpush1.bf16.msra.mxu0 %v3008_v33  ;;  %1886 = vmatprep.mubr.bf16.mxu0 %v3113_v25 }
  0xf5   : > { %1842 = vmatpush1.bf16.msra.mxu1 %v3005_v32 }
  0xf6   : > { %1843 = vmatprep.subr.bf16.mxu1 %v3013_v34 }
  0xf9   : > { %1844 = vmatpush1.bf16.msra.mxu1 %v3011_v35 }
  0xfb   : > { %2597 = vmatmul.mubr.msk.bf16.vlgmr.msra.gmra.mrb[12].mxu0 %vm1563_vm1, %v3300_v29 }
  0xfc   : > { %1846 = vmatmul.mubr.bf16.vlgmr.msra.gmra.mrb[12].mxu1 %v3371_v26 }
 0x146   : > { %v1601_v36 = vpop.f32.mrb[0].mxu0 }
 0x147   : > { %v1642_v37 = vpop.f32.mrb[0].mxu1  ;;  %v1603_v39 = vpop.f32.mrb[1].mxu0 }
 0x148   : > { %v1643_v38 = vadd.f32 %v1642_v37, %v1601_v36  ;;  %v1644_v40 = vpop.f32.mrb[1].mxu1  ;;  %v1605_v41 = vpop.f32.mrb[2].mxu0 }
 0x149   : > { %v1645_v63 = vadd.f32 %v1644_v40, %v1603_v39  ;;  %v1646_v19 = vpop.f32.mrb[2].mxu1  ;;  %v1606_v42 = vpop.f32.mrb[3].mxu0 }
 0x14a   : > { %v1647_v43 = vpop.f32.mrb[3].mxu1 }
 0x14f   : > { %v1724_v18 = vpop.f32.mrb[4].mxu1 }
 0x150   : > { %v1726_v44 = vpop.f32.mrb[5].mxu1 }
 0x151   : > { %v1728_v46 = vpop.f32.mrb[6].mxu1 }
 0x152   : > { %v1729_v25 = vpop.f32.mrb[7].mxu1 }
 0x186   : > { %v1683_v47 = vpop.f32.mrb[4].mxu0 }
 0x187   : > { %v1684_v48 = vadd.f32 %v1683_v47, %v1643_v38  ;;  %v1685_v26 = vpop.f32.mrb[5].mxu0 }
 0x188   : > { %v1686_v49 = vadd.f32 %v1685_v26, %v1645_v63  ;;  %v1687_v29 = vpop.f32.mrb[6].mxu0 }
 0x189   : > { %v1725_v50 = vadd.f32 %v1724_v18, %v1684_v48  ;;  %v1688_v52 = vpop.f32.mrb[7].mxu0 }
 0x18a   : > { %v1727_v53 = vadd.f32 %v1726_v44, %v1686_v49 }
 0x18b   : > { %v1895_v54 = vadd.f32 %v1725_v50, %v355_v45 }
 0x18c   : > { %v1896_v55 = vadd.f32 %v1727_v53, %v356_v51 }
 0x18d   : > { %1899 = vst [vmem:[#allocation2] sm:$0xff] %v1895_v54 }
 0x18e   : > { %1900 = vst [vmem:[#allocation2 + $0x8] sm:$0xff] %v1896_v55 }
 0x18f   : > { %v1765_v56 = vpop.f32.mrb[8].mxu1 }
 0x190   : > { %v1767_v57 = vpop.f32.mrb[9].mxu1 }
 0x191   : > { %v1769_v58 = vpop.f32.mrb[10].mxu1 }
 0x192   : > { %v1770_v59 = vpop.f32.mrb[11].mxu1 }
 0x1c6   : > { %v1806_v60 = vpop.f32.mrb[8].mxu0 }
 0x1c7   : > { %v1807_v61 = vadd.f32 %v1806_v60, %v1765_v56  ;;  %v1808_v62 = vpop.f32.mrb[9].mxu0 }
 0x1c8   : > { %v1809_v0 = vadd.f32 %v1808_v62, %v1767_v57  ;;  %v1810_v1 = vpop.f32.mrb[10].mxu0 }
 0x1c9   : > { %v1811_v2 = vpop.f32.mrb[11].mxu0 }
 0x1ce   : > { %v1888_v4 = vpop.f32.mrb[12].mxu0 }
 0x1cf   : > { %v1847_v3 = vpop.f32.mrb[12].mxu1  ;;  %v1890_v7 = vpop.f32.mrb[13].mxu0 }
 0x1d0   : > { %v1848_v5 = vadd.f32 %v1847_v3, %v1807_v61  ;;  %v1849_v6 = vpop.f32.mrb[13].mxu1  ;;  %v1892_v11 = vpop.f32.mrb[14].mxu0 }
 0x1d1   : > { %v1850_v8 = vadd.f32 %v1849_v6, %v1809_v0  ;;  %v1851_v10 = vpop.f32.mrb[14].mxu1  ;;  %v1893_v15 = vpop.f32.mrb[15].mxu0 }
 0x1d2   : > { %v1889_v12 = vadd.f32 %v1888_v4, %v1848_v5  ;;  %v1852_v14 = vpop.f32.mrb[15].mxu1 }
 0x1d3   : > { %v1891_v16 = vadd.f32 %v1890_v7, %v1850_v8 }
 0x1d4   : > { %v1897_v17 = vadd.f32 %v1889_v12, %v357_v9 }
 0x1d5   : > { %v1898_v20 = vadd.f32 %v1891_v16, %v358_v13 }
 0x1d6   : > { %1901 = vst [vmem:[#allocation2 + $0x10] sm:$0xff] %v1897_v17 }
 0x1d7   : > { %1902 = vst.msk [vmem:[#allocation2 + $0x18] sm:$0xff] %vm1563_vm1, %v1898_v20 }
 0x1d8 PF: > { %p2598_p3 = scmp.lt.s32.totalorder %s3180_s18, 2 }
 0x1d9   : > { %v3014_v21 = vld [vmem:[%s3194_s28 + $0x40] sm:$0xff] (!%p2598_p3)   ;;  %v3114_v22 = vmov (!%p2598_p3), 0   ;;  %v3017_v27 = vld [vmem:[%s3194_s28 + $0x48] sm:$0xff] (!%p2598_p3)   ;;  %v3020_v31 = vld [vmem:[%s3194_s28 + $0x50] sm:$0xff] (!%p2598_p3)   ;;  %vm2120_vm2 = vcmask (!%p2598_p3), 130048  }
 0x1da   : > { %1906 = sbr.rel (%p2598_p3) target bundleno = 727 (0x2d7), region = 60  ;;  %2164 = vmatprep.subr.bf16.mxu1 (!%p2598_p3), %v3114_v22  ;;  %v3015_v23 = vld [vmem:[%s3194_s28 + $0x80] sm:$0xff] (!%p2598_p3)   ;;  %2639 = vmatprep.subr.bf16.mxu0 (!%p2598_p3), %v3014_v21  ;;  %v3018_v28 = vld [vmem:[%s3194_s28 + $0x88] sm:$0xff] (!%p2598_p3)   ;;  %v3021_v32 = vld [vmem:[%s3194_s28 + $0x90] sm:$0xff] (!%p2598_p3)  }
 0x1db   : > { %v3016_v24 = vld [vmem:[%s3194_s28] sm:$0xff] (!%p2598_p3)   ;;  %2165 = vmatpush1.bf16.msra.mxu1 (!%p2598_p3), %v3015_v23  ;;  %v3019_v30 = vld [vmem:[%s3194_s28 + $0x8] sm:$0xff] (!%p2598_p3)   ;;  %v3022_v33 = vld [vmem:[%s3194_s28 + $0x10] sm:$0xff] (!%p2598_p3)  }
 0x1dc   : > { %2640 = vmatpush3.bf16.msra.mxu0 (!%p2598_p3), %v3016_v24  ;;  %2166 = vmatprep.subr.bf16.mxu1 (!%p2598_p3), %v3114_v22  ;;  %v3023_v34 = vld [vmem:[%s3194_s28 + $0x58] sm:$0xff] (!%p2598_p3)   ;;  %v3026_v37 = vld [vmem:[%s3194_s28 + $0x60] sm:$0xff] (!%p2598_p3)   ;;  %v3029_v40 = vld [vmem:[%s3194_s28 + $0x68] sm:$0xff] (!%p2598_p3)  }
 0x1dd   : > { %2641 = vmatprep.subr.bf16.mxu0 (!%p2598_p3), %v3017_v27  ;;  %v3024_v35 = vld [vmem:[%s3194_s28 + $0x98] sm:$0xff] (!%p2598_p3)   ;;  %v3027_v38 = vld [vmem:[%s3194_s28 + $0xa0] sm:$0xff] (!%p2598_p3)   ;;  %v3030_v63 = vld [vmem:[%s3194_s28 + $0xa8] sm:$0xff] (!%p2598_p3)  }
 0x1de   : > { %v3025_v36 = vld [vmem:[%s3194_s28 + $0x18] sm:$0xff] (!%p2598_p3)   ;;  %v3028_v39 = vld [vmem:[%s3194_s28 + $0x20] sm:$0xff] (!%p2598_p3)   ;;  %v3031_v41 = vld [vmem:[%s3194_s28 + $0x28] sm:$0xff] (!%p2598_p3)  }
 0x1df   : > { %2167 = vmatpush1.bf16.msra.mxu1 (!%p2598_p3), %v3018_v28  ;;  %v3032_v19 = vld [vmem:[%s3194_s28 + $0x70] sm:$0xff] (!%p2598_p3)   ;;  %v1908_v18 = vld [vmem:[#allocation2 + $0x8] sm:$0xff] (!%p2598_p3)  ;;  %v1907_v44 = vld [vmem:[#allocation2] sm:$0xff] (!%p2598_p3) }
 0x1e0   : > { %2642 = vmatpush3.bf16.msra.mxu0 (!%p2598_p3), %v3019_v30  ;;  %2168 = vmatprep.subr.bf16.mxu1 (!%p2598_p3), %v3114_v22  ;;  %v3033_v42 = vld [vmem:[%s3194_s28 + $0xb0] sm:$0xff] (!%p2598_p3)   ;;  %v3035_v46 = vld [vmem:[%s3194_s28 + $0x78] sm:$0xff] (!%p2598_p3)   ;;  %v1912_v25 = vmax.f32 (!%p2598_p3), %v1908_v18, 0.0  ;;  %v1911_v49 = vmax.f32 (!%p2598_p3), %v1907_v44, 0.0  ;;  %v3038_v54 = vld [vmem:[%s3194_s28 + $0xc0] sm:$0xff] (!%p2598_p3)  }
 0x1e1   : > { %2643 = vmatprep.subr.bf16.mxu0 %v3020_v31  ;;  %v3034_v43 = vld [vmem:[%s3194_s28 + $0x30] sm:$0xff]   ;;  %v1910_v47 = vld [vmem:[#allocation2 + $0x18] sm:$0xff]  ;;  %v1919_v61 = vld [vmem:[#allocation3] sm:$0xff] }
 0x1e2   : > { %v1914_v48 = vmax.f32 %v1910_v47, 0.0  ;;  %v3036_v26 = vld [vmem:[%s3194_s28 + $0xb8] sm:$0xff]   ;;  %v1916_v45 = vpack.c.bf16 %v1912_v25, %v1912_v25  ;;  %v1909_v29 = vld [vmem:[#allocation2 + $0x10] sm:$0xff]  ;;  %v1915_v53 = vpack.c.bf16 %v1911_v49, %v1911_v49 }
 0x1e3   : > { %2169 = vmatpush1.bf16.msra.mxu1 %v3021_v32  ;;  %v3037_v50 = vld [vmem:[%s3194_s28 + $0x38] sm:$0xff]   ;;  %v1913_v52 = vmax.f32 %v1909_v29, 0.0 }
 0x1e4   : > { %2644 = vmatpush3.bf16.msra.mxu0 %v3022_v33  ;;  %2170 = vmatprep.subr.bf16.mxu1 %v3114_v22  ;;  %v1918_v51 = vpack.c.bf16 %v1914_v48, %v1914_v48 }
 0x1e5   : > { %2645 = vmatprep.subr.bf16.mxu0 %v3023_v34  ;;  %2156 = vmatprep.mubr.bf16.mxu0 %v1916_v45  ;;  %v1917_v55 = vpack.c.bf16 %v1913_v52, %v1913_v52 }
 0x1e6   : > { %2624 = vmatprep.mubr.msk.bf16.mxu1 %vm2120_vm2, %v1918_v51 }
 0x1e7   : > { %2171 = vmatpush1.bf16.msra.mxu1 %v3024_v35 }
 0x1e8   : > { %2646 = vmatpush3.bf16.msra.mxu0 %v3025_v36  ;;  %2172 = vmatprep.subr.bf16.mxu1 %v3114_v22 }
 0x1e9   : > { %2647 = vmatprep.subr.bf16.mxu0 %v3026_v37 }
 0x1eb   : > { %2173 = vmatpush1.bf16.msra.mxu1 %v3027_v38 }
 0x1ec   : > { %2648 = vmatpush3.bf16.msra.mxu0 %v3028_v39  ;;  %2174 = vmatprep.subr.bf16.mxu1 %v3114_v22 }
 0x1ed   : > { %2649 = vmatprep.subr.bf16.mxu0 %v3029_v40 }
 0x1ef   : > { %2175 = vmatpush1.bf16.msra.mxu1 %v3030_v63 }
 0x1f0   : > { %2650 = vmatpush3.bf16.msra.mxu0 %v3031_v41  ;;  %2176 = vmatprep.subr.bf16.mxu1 %v3114_v22 }
 0x1f1   : > { %2651 = vmatprep.subr.bf16.mxu0 %v3032_v19 }
 0x1f3   : > { %2177 = vmatpush1.bf16.msra.mxu1 %v3033_v42 }
 0x1f4   : > { %2652 = vmatpush3.bf16.msra.mxu0 %v3034_v43  ;;  %2178 = vmatprep.subr.bf16.mxu1 %v3114_v22 }
 0x1f5   : > { %2653 = vmatprep.subr.bf16.mxu0 %v3035_v46 }
 0x1f7   : > { %2179 = vmatpush1.bf16.msra.mxu1 %v3036_v26 }
 0x1f8   : > { %2654 = vmatpush3.bf16.msra.mxu0 %v3037_v50  ;;  %2180 = vmatprep.subr.bf16.mxu1 %v3114_v22 }
 0x1fb   : > { %2157 = vmatmul.mubr.bf16.vlgmr.msra.gmra.mrb[0].mxu0 %v1915_v53  ;;  %2181 = vmatpush1.bf16.msra.mxu1 %v3038_v54 }
 0x1fe   : > { %2197 = vmatmul.mubr.bf16.vlgmr.msra.gmra.mrb[0].mxu1 %v1917_v55 }
 0x2ce   : > { %v2655_v56 = vpop.f32.mrb[0].mxu0 }
 0x2cf   : > { %v2656_v57 = vpop.f32.mrb[1].mxu0 }
 0x2d0   : > { %v2657_v58 = vadd.f32 %v2656_v57, %v2655_v56  ;;  %v2658_v59 = vpop.f32.mrb[2].mxu0 }
 0x2d1   : > { %v2659_v60 = vpop.f32.mrb[3].mxu0  ;;  %v2198_v62 = vpop.f32.mrb[0].mxu1 }
 0x2d2   : > { %v2199_v0 = vadd.f32 %v2657_v58, %v2198_v62  ;;  %v2200_v1 = vpop.f32.mrb[1].mxu1 }
 0x2d3   : > { %v2201_v2 = vpop.f32.mrb[2].mxu1 }
 0x2d4   : > { %v2204_v3 = vadd.f32 %v2199_v0, %v1919_v61  ;;  %v2202_v4 = vpop.f32.mrb[3].mxu1 }
 0x2d6   : > { %2205 = vst [vmem:[#allocation3] sm:$0xff] %v2204_v3 }
 0x2d7 PF: > { %p2625_p4 = scmp.ne.s32.totalorder %s3180_s18, 3 }
 0x2d8   : > { %v3039_v5 = vld [vmem:[%s3546_s7] sm:$0xff] (!%p2625_p4)   ;;  %v3115_v6 = vmov (!%p2625_p4), 0.0   ;;  %v3040_v7 = vld [vmem:[%s3546_s7 + $0x8] sm:$0xff] (!%p2625_p4)   ;;  %vm3116_vm3 = vmmov (!%p2625_p4), 0   ;;  %v3041_v8 = vld [vmem:[%s3546_s7 + $0x10] sm:$0xff] (!%p2625_p4)   ;;  %vm2324_vm4 = vcmask (!%p2625_p4), 80896  }
 0x2d9   : > { %2209 = sbr.rel (%p2625_p4) target bundleno = 976 (0x3d0), region = 64  ;;  %2670 = vmatprep.subr.bf16.mxu0 (!%p2625_p4), %v3115_v6  ;;  %2686 = vmatprep.mubr.msk.bf16.mxu0 (!%p2625_p4), %vm3116_vm3, %v3115_v6  ;;  %v3042_v9 = vld [vmem:[%s3546_s7 + $0x18] sm:$0xff] (!%p2625_p4)   ;;  %v3043_v10 = vld [vmem:[%s3546_s7 + $0x20] sm:$0xff] (!%p2625_p4)   ;;  %v3044_v11 = vld [vmem:[%s3546_s7 + $0x28] sm:$0xff] (!%p2625_p4)  }
 0x2da   : > { %2671 = vmatpush3.bf16.msra.mxu0 (!%p2625_p4), %v3039_v5  ;;  %v3045_v12 = vld [vmem:[%s3546_s7 + $0x30] sm:$0xff] (!%p2625_p4)   ;;  %v3046_v15 = vld [vmem:[%s3546_s7 + $0x38] sm:$0xff] (!%p2625_p4)   ;;  %v2626_v17 = vld [vmem:[%s3547_s8] ss:$0 sm:$0xff] (!%p2625_p4) }
 0x2db   : > { %2672 = vmatprep.subr.bf16.mxu0 (!%p2625_p4), %v3115_v6 }
 0x2dd   : > { %v2210_v13 = vld [vmem:[#allocation3] sm:$0xff] (!%p2625_p4) }
 0x2de   : > { %2673 = vmatpush3.bf16.msra.mxu0 (!%p2625_p4), %v3040_v7  ;;  %v2211_v14 = vmax.f32 (!%p2625_p4), %v2210_v13, 0.0 }
 0x2df   : > { %2674 = vmatprep.subr.bf16.mxu0 (!%p2625_p4), %v3115_v6 }
 0x2e0   : > { %v2212_v16 = vpack.c.bf16 %v2211_v14, %v2211_v14 }
 0x2e2   : > { %2675 = vmatpush3.bf16.msra.mxu0 %v3041_v8 }
 0x2e3   : > { %2676 = vmatprep.subr.bf16.mxu0 %v3115_v6 }
 0x2e6   : > { %2677 = vmatpush3.bf16.msra.mxu0 %v3042_v9 }
 0x2e7   : > { %2678 = vmatprep.subr.bf16.mxu0 %v3115_v6 }
 0x2ea   : > { %2679 = vmatpush3.bf16.msra.mxu0 %v3043_v10 }
 0x2eb   : > { %2680 = vmatprep.subr.bf16.mxu0 %v3115_v6 }
 0x2ee   : > { %2681 = vmatpush3.bf16.msra.mxu0 %v3044_v11 }
 0x2ef   : > { %2682 = vmatprep.subr.bf16.mxu0 %v3115_v6 }
 0x2f2   : > { %2683 = vmatpush3.bf16.msra.mxu0 %v3045_v12 }
 0x2f3   : > { %2684 = vmatprep.subr.bf16.mxu0 %v3115_v6 }
 0x2f6   : > { %2685 = vmatpush3.bf16.msra.mxu0 %v3046_v15 }
 0x2f9   : > { %2687 = vmatmul.mubr.bf16.vlgmr.msra.gmra.mrb[0].mxu0 %v2212_v16 }
 0x3cc   : > { %v2318_v20 = vpop.f32.mrb[0].mxu0 }
 0x3cd   : > { %v2319_v21 = vadd.f32 %v2626_v17, %v2318_v20  ;;  %v2688_v22 = vpop.f32.mrb[1].mxu0 }
 0x3ce   : > { %v2321_v23 = vpop.f32.mrb[2].mxu0 }
 0x3cf   : > { %2325 = vst.msk [vmem:[#allocation7] sm:$0xff] %vm2324_vm4, %v2319_v21  ;;  %v2689_v24 = vpop.f32.mrb[3].mxu0 }
 0x3d0 PF: > { %p2696_p5 = scmp.eq.s32.totalorder %s3180_s18, 3  ;;  %s3117_s17 = smov [#allocation7]  }
 0x3d1   : > { %s2333_s0 = sshll.u32 %s3117_s17, 4  ;;  %s2334_s0 = int_to_ptr.vmem [resolvable:$true] %s2333_s0 }
 0x3d2   : > { %s3071_s19 = scalar_lea.vmem %s2334_s0, 128  ;;  %p3078_p9 = scmp.lt.s32.totalorder %s2334_s0, %s2334_s0 }
 0x3d3   : > { %p3072_p6 = scmp.ne.s32.totalorder %s2334_s0, %s3071_s19  ;;  %p3079_p10 = scmp.lt.s32.totalorder %s3071_s19, %s3071_s19 }
 0x3d5   : > { %p3073_p7 = pnand %p3072_p6, %p2696_p5  ;;  %p3080_p11 = por %p3079_p10, %p3078_p9 }
 0x3d7   : > { %p3074_p8 = pneg %p3073_p7 }
 0x3d9   : > { %p3081_p12 = pnand %p3080_p11, %p3074_p8 }
 0x3db   : > { %3084 = shalt.err (!%p3081_p12)
}
 0x3dc   : > { %s3085_s22 = scalar_lea.hbm %s3548_s9, 128 }
 0x3dd   : > { %p3086_p13 = scmp.ne.s32.totalorder %s3548_s9, %s3085_s22  ;;  %p3091_p2 = scmp.lt.u32.totalorder %s3085_s22, %s3548_s9 }
 0x3df   : > { %p3087_p0 = pnand %p3086_p13, %p2696_p5 }
 0x3e1   : > { %p3088_p1 = pneg %p3087_p0 }
 0x3e3   : > { %p3093_p3 = pnand %p3091_p2, %p3088_p1 }
 0x3e5   : > { %3096 = shalt.err (!%p3093_p3)
}
 0x3e6   : > { %2693 = dma.vmem_to_hbm [thread:$0]  (%p2696_p5), %s2334_s0, 128, %s3548_s9, [#allocation8]  }
 0x3e7   : > { %3104 = dma.done.wait (%p2696_p5), [#allocation8], 128  }
 0x3e8   : > { %3106 = vsyncadd (%p2696_p5), [#allocation8], 4294967168 }
 0x3e9 PF: > { %s30_s1 = sadd.s32 1, %s3109_s1  }
 0x3ea   : > { %p27_p4 = scmp.ge.s32.totalorder %s30_s1, 6  }
 0x3ec   :  { %29 = sbr.rel (!%p27_p4) target bundleno = 26 (0x1a), region = 94 }
 0x3f3   :  { %2346 = vsyncpa [#allocation8], 1 }
 0x3f4   :  { %2348 = vsyncpa [#allocation8 + $0x1], 1 }

</bundles_post_ra>
